<compile_context>
chip_gen: v5e
topology: v5e:2x2
jax: 0.10.0
libtpu: 0.0.40
codegen_flags: <defaults>
</compile_context>

<pallas_src>
import functools

import jax
import jax.numpy as jnp
from jax import lax
from jax.experimental import pallas as pl
from jax.experimental.pallas import tpu as pltpu

EPS = 1e-5                      # BatchNorm eps (eval mode, running stats)
MM_DTYPE = jnp.bfloat16         # MXU operand dtype (f32 accumulation)
IO_DTYPE = jnp.bfloat16         # activation dtype on HBM (kernel I/O)
LANE = 128                      # lane tile (last dim)
SUBLANE_PAD = 16                # channel-segment alignment (bf16 sublane pack)


def _round_up(x, m):
    return (x + m - 1) // m * m


def _mm(a, b):
    """a [M, K] x b [K, N] matmul (f32 accumulation, bf16 operands)."""
    return lax.dot_general(
        a.astype(MM_DTYPE), b.astype(MM_DTYPE),
        dimension_numbers=(((1,), (0,)), ((), ())),
        preferred_element_type=jnp.float32)


def _gram(a, b):
    """a [M, K] x b [N, K], contracting the minor (lane) dim of both -> [M, N]."""
    return lax.dot_general(
        a.astype(MM_DTYPE), b.astype(MM_DTYPE),
        dimension_numbers=(((1,), (1,)), ((), ())),
        preferred_element_type=jnp.float32)


# --------------------------- fused CNL + PNL kernel ---------------------------
def mfa_fused_kernel(xh_ref, xl_ref,
                     wxl_ref, wthc_ref, wthp_ref, wwc_ref, wwp_ref, bias_ref,
                     out_ref, *, reduc_ratio, valid_lanes):
    r = reduc_ratio
    xh = xh_ref[0]                        # [Ch, Np] bf16
    xl = xl_ref[0]                        # [Cl, Np] bf16
    Ch, Np = xh.shape
    Clp = wthc_ref.shape[0]               # padded low_dim
    Crp = wthp_ref.shape[0]               # padded low_dim // reduc_ratio
    N2p = Np // r                         # lane width of one PNL slab (x128)

    # Packed per-channel biases: [b_xl | b_theta_c | b_theta_p | b_W_c | b_W_p]
    biases = bias_ref[...]                # [Btot, 1] f32 (segment starts aligned)
    o = 0
    b_xl  = biases[o:o + 2 * Clp + 2 * Crp]; o += 2 * Clp + 2 * Crp
    b_thc = biases[o:o + Clp];               o += Clp
    b_thp = biases[o:o + Crp];               o += Crp
    b_wc  = biases[o:o + Ch];                o += Ch
    b_wp  = biases[o:o + Ch]

    # ---- all xl-driven 1x1 convs in one stacked matmul (CNL g/phi, PNL g/phi)
    xl_feats = _mm(wxl_ref[...], xl) + b_xl              # [2Clp+2Crp, Np] f32
    g_c   = xl_feats[0:Clp]                              # [Clp, Np]
    phi_c = xl_feats[Clp:2 * Clp]                        # [Clp, Np]
    g_p   = xl_feats[2 * Clp:2 * Clp + Crp]              # [Crp, Np]
    phi_p = xl_feats[2 * Clp + Crp:2 * Clp + 2 * Crp]    # [Crp, Np] (pre-scaled 1/Nl2)

    # Padded spatial lanes carry the conv bias; zero them on the phi features so
    # the spatial contractions (CNL gram over Np, PNL gram per slab) are exact.
    if valid_lanes != N2p:
        lane = lax.broadcasted_iota(jnp.int32, (1, N2p), 1)
        mask = jnp.tile((lane < valid_lanes).astype(jnp.float32), (1, r))   # [1, Np]
        phi_c = phi_c * mask
        phi_p = phi_p * mask

    # --------------------------------- CNL ----------------------------------
    theta_c = _mm(wthc_ref[...], xh) + b_thc             # [Clp, Np] (pre-scaled 1/Cl)
    att_c = _gram(theta_c, phi_c)                        # [Clp, Clp] == energy / Cl
    y_c = _mm(att_c, g_c)                                # [Clp, Np]
    z = _mm(wwc_ref[...], y_c) + b_wc + xh.astype(jnp.float32)   # [Ch, Np] f32 (BN folded)

    # ------------- PNL (reassociated + blocked over the .view regroup) -------
    # PyTorch's .view(B, low_dim, -1) regroups [Cr, N] as [Cl, N/r]; the blocked
    # form works on lane slabs of the un-reshaped tensors, so there is no
    # lane-splitting reshape and no O(N^2) energy matrix.  bf16 operand casts
    # are hoisted out of the r x r loop; the epilogue is stored slab-wise.
    theta_p = (_mm(wthp_ref[...], z) + b_thp).astype(MM_DTYPE)   # [Crp, Np] bf16
    g_p = g_p.astype(MM_DTYPE)
    phi_p = phi_p.astype(MM_DTYPE)
    wwp = wwp_ref[...]                                           # [Ch, Crp] bf16
    for j in range(r):
        g_j = g_p[:, j * N2p:(j + 1) * N2p]                      # [Crp, N2p]
        acc = None
        for jp in range(r):
            s = _gram(g_j, phi_p[:, jp * N2p:(jp + 1) * N2p])    # [Crp, Crp]
            part = _mm(s, theta_p[:, jp * N2p:(jp + 1) * N2p])   # [Crp, N2p]
            acc = part if acc is None else acc + part
        out_slab = _mm(wwp, acc) + b_wp + z[:, j * N2p:(j + 1) * N2p]
        out_ref[0, :, j * N2p:(j + 1) * N2p] = out_slab.astype(out_ref.dtype)


# ------------------------- host-side parameter folding ------------------------
def _fold_bn(ww, bw, gamma, beta, mean, var):
    s = gamma * lax.rsqrt(var + EPS)
    return ww * s[:, None], s * (bw - mean) + beta


def _pad_rows(w, b, rows_p):
    pad = rows_p - w.shape[0]
    if pad:
        w = jnp.pad(w, ((0, pad), (0, 0)))
        b = jnp.pad(b, ((0, pad),))
    return w, b


def _pad_cols(w, cols_p):
    pad = cols_p - w.shape[1]
    return jnp.pad(w, ((0, 0), (0, pad))) if pad else w


def _prepare_params(params, Cl, Clp, Crp, Nl2):
    """Fold BN + attention scales, pad channel segments, pack weights/biases."""
    c, p = params['cnl'], params['pnl']

    wwc, bwc = _fold_bn(c['ww'], c['bw'], c['gamma'], c['beta'], c['mean'], c['var'])
    wwp, bwp = _fold_bn(p['ww'], p['bw'], p['gamma'], p['beta'], p['mean'], p['var'])

    wthc, bthc = c['wth'] / Cl, c['bth'] / Cl            # fold CNL attention 1/Cl
    wphip, bphip = p['wphi'] / Nl2, p['bphi'] / Nl2      # fold PNL attention 1/Nl2

    # Stack all xl-driven convs; pad each segment to SUBLANE_PAD rows so the
    # in-kernel row slices land on tile boundaries (zero rows are inert).
    wg_c, bg_c = _pad_rows(c['wg'], c['bg'], Clp)
    wph_c, bph_c = _pad_rows(c['wphi'], c['bphi'], Clp)
    wg_p, bg_p = _pad_rows(p['wg'], p['bg'], Crp)
    wph_p, bph_p = _pad_rows(wphip, bphip, Crp)
    w_xl = jnp.concatenate([wg_c, wph_c, wg_p, wph_p], axis=0)
    b_xl = jnp.concatenate([bg_c, bph_c, bg_p, bph_p], axis=0)

    wthc, bthc = _pad_rows(wthc, bthc, Clp)              # [Clp, Ch]
    wthp, bthp = _pad_rows(p['wth'], p['bth'], Crp)      # [Crp, Ch]
    wwc = _pad_cols(wwc, Clp)                            # [Ch, Clp]
    wwp = _pad_cols(wwp, Crp)                            # [Ch, Crp]

    biases = jnp.concatenate(
        [b_xl, bthc, bthp, bwc, bwp], axis=0).astype(jnp.float32)[:, None]
    weights = [w.astype(MM_DTYPE) for w in (w_xl, wthc, wthp, wwc, wwp)]
    return weights, biases


# ----------------------------- VMEM budgeting ---------------------------------
def _vmem_capacity_bytes():
    try:
        return int(pltpu.get_tpu_info().vmem_capacity_bytes)
    except Exception:
        return 64 << 20          # conservative fallback: v7x per-core VMEM


def _vmem_budget_bytes(Ch, Cl, Clp, Crp, Np, r, n_weight_elems, n_bias_rows):
    """Per-grid-step VMEM estimate (bf16 I/O + f32 temps), capped per generation."""
    BF, F4 = 2, 4
    N2p = Np // r
    est = 2 * (Ch + Cl) * Np * BF             # double-buffered bf16 inputs (xh, xl)
    est += 2 * Ch * Np * BF                   # double-buffered bf16 output
    est += 2 * (n_weight_elems * BF           # weight buffers (worst-case double)
                + _round_up(n_bias_rows, 8) * LANE * F4)   # lane-padded bias column
    est += (2 * Clp + 2 * Crp) * Np * F4      # stacked xl features
    est += 2 * Clp * Np * F4                  # theta_c, y_c
    est += Ch * Np * (F4 + BF)                # z (+ bf16 copy for theta_p matmul)
    est += Crp * Np * (F4 + 3 * BF)           # theta_p f32/bf16 + g_p/phi_p bf16 copies
    est += (Crp + Ch) * N2p * F4              # per-slab acc / epilogue slab
    est = int(est * 1.35)                     # relayout / transient headroom
    cap = int(_vmem_capacity_bytes() * 0.85)  # ~54 MiB v7x, ~108 MiB v5e/v6e
    # TODO(synk): if est > cap at target shapes, switch to a two-pass Nh-tiled grid.
    return max(min(est, cap), min(32 << 20, cap))


# ----------------------------- pallas_call builder -----------------------------
def _build_call(B, Ch, Cl, Np, weight_shapes, bias_shape, r, valid_lanes,
                vmem_bytes, single_buffer_params):
    in_specs = [pl.BlockSpec((1, Ch, Np), lambda b: (b, 0, 0)),
                pl.BlockSpec((1, Cl, Np), lambda b: (b, 0, 0))]
    # Grid-invariant parameters: single-buffer when the runtime supports it.
    extra = (dict(pipeline_mode=pl.Buffered(buffer_count=1))
             if single_buffer_params else {})
    for shp in weight_shapes:
        in_specs.append(pl.BlockSpec(shp, lambda b: (0, 0), **extra))
    in_specs.append(pl.BlockSpec(bias_shape, lambda b: (0, 0), **extra))

    return pl.pallas_call(
        functools.partial(mfa_fused_kernel, reduc_ratio=r, valid_lanes=valid_lanes),
        out_shape=jax.ShapeDtypeStruct((B, Ch, Np), IO_DTYPE),
        grid=(B,),
        in_specs=in_specs,
        out_specs=pl.BlockSpec((1, Ch, Np), lambda b: (b, 0, 0)),
        compiler_params=pltpu.CompilerParams(
            dimension_semantics=("parallel",),      # megacore: shard batch on v7x
            vmem_limit_bytes=vmem_bytes),
    )


# --------------------------------- forward ------------------------------------
def mfa_block_forward(x, x0, params, reduc_ratio=2):
    """MFA_block forward (flag=0).  x: [B, high_dim, H, W], x0: [B, low_dim, H, W].

    Activations travel through HBM as bf16; the returned tensor is bf16.
    """
    B, Ch, H, W = x.shape
    B0, Cl, H0, W0 = x0.shape
    assert B == B0 and (H, W) == (H0, W0), "flag=0 CNL requires matching spatial sizes"
    r = reduc_ratio
    N = H * W
    assert N % r == 0 and Cl % r == 0
    N2 = N // r
    N2p = _round_up(N2, LANE)              # lane-align each PNL slab
    Np = r * N2p
    Clp = _round_up(Cl, SUBLANE_PAD)
    Crp = _round_up(Cl // r, SUBLANE_PAD)

    def pad_spatial(t):                    # slab-aware zero pad of flattened spatial dim
        Bc, C = t.shape[:2]
        t = t.reshape(Bc, C, r, N2)
        if N2p != N2:
            t = jnp.pad(t, ((0, 0), (0, 0), (0, 0), (0, N2p - N2)))
        return t.reshape(Bc, C, Np)

    xh = pad_spatial(x.reshape(B, Ch, N).astype(IO_DTYPE))
    xl = pad_spatial(x0.reshape(B, Cl, N).astype(IO_DTYPE))

    weights, biases = _prepare_params(params, Cl, Clp, Crp, N2)
    vmem_bytes = _vmem_budget_bytes(Ch, Cl, Clp, Crp, Np, r,
                                    sum(w.size for w in weights), biases.shape[0])

    args = [xh, xl] + weights + [biases]
    out, err = None, None
    for single_buf in (True, False):       # fall back if pl.Buffered(1) is unsupported
        try:
            call = _build_call(B, Ch, Cl, Np, [w.shape for w in weights],
                               biases.shape, r, N2, vmem_bytes, single_buf)
            out = call(*args)
            break
        except Exception as e:
            err = e
    if out is None:
        raise err

    out = out.reshape(B, Ch, r, N2p)[:, :, :, :N2].reshape(B, Ch, H, W)
    return out


# ----------------------------- parameters ------------------------------------
def init_params(key, high_dim, low_dim, reduc_ratio=2):
    ks = jax.random.split(key, 16)

    def w(k, o, i):
        return 0.1 * jax.random.normal(k, (o, i), jnp.float32)

    def b(k, o):
        return 0.1 * jax.random.normal(k, (o,), jnp.float32)

    def bn(c):  # init.constant_(weight, 0), init.constant_(bias, 0); eval stats
        return dict(gamma=jnp.zeros((c,), jnp.float32),
                    beta=jnp.zeros((c,), jnp.float32),
                    mean=jnp.zeros((c,), jnp.float32),
                    var=jnp.ones((c,), jnp.float32))

    cnl = dict(wg=w(ks[0], low_dim, low_dim), bg=b(ks[1], low_dim),
               wth=w(ks[2], low_dim, high_dim), bth=b(ks[3], low_dim),
               wphi=w(ks[4], low_dim, low_dim), bphi=b(ks[5], low_dim),
               ww=w(ks[6], high_dim, low_dim), bw=b(ks[7], high_dim),
               **bn(high_dim))
    cr = low_dim // reduc_ratio
    pnl = dict(wg=w(ks[8], cr, low_dim), bg=b(ks[9], cr),
               wth=w(ks[10], cr, high_dim), bth=b(ks[11], cr),
               wphi=w(ks[12], cr, low_dim), bphi=b(ks[13], cr),
               ww=w(ks[14], high_dim, cr), bw=b(ks[15], high_dim),
               **bn(high_dim))
    return dict(cnl=cnl, pnl=pnl)


# ----------------------------- pure-JAX reference ----------------------------
def _conv1x1(x, w, b):   # x: [B, Ci, N]
    return jnp.einsum('oc,bcn->bon', w, x) + b[None, :, None]


def _bn_ref(x, p):
    return ((x - p['mean'][None, :, None]) * lax.rsqrt(p['var'][None, :, None] + EPS)
            * p['gamma'][None, :, None] + p['beta'][None, :, None])


def _ref_cnl(xh, xl, p):
    g_x = _conv1x1(xl, p['wg'], p['bg'])
    th = _conv1x1(xh, p['wth'], p['bth'])
    ph = _conv1x1(xl, p['wphi'], p['bphi'])
    energy = jnp.einsum('bcn,bdn->bcd', th, ph)
    att = energy / energy.shape[-1]
    y = jnp.einsum('bcd,bdn->bcn', att, g_x)
    return _bn_ref(_conv1x1(y, p['ww'], p['bw']), p) + xh


def _ref_pnl(xh, xl, p, low_dim):
    B, Ch, Nh = xh.shape
    cr = p['wg'].shape[0]
    g_r = _conv1x1(xl, p['wg'], p['bg']).reshape(B, low_dim, -1)
    th_r = _conv1x1(xh, p['wth'], p['bth']).reshape(B, low_dim, -1)
    ph_r = _conv1x1(xl, p['wphi'], p['bphi']).reshape(B, low_dim, -1)
    energy = jnp.einsum('bcm,bcn->bmn', th_r, ph_r)
    att = energy / energy.shape[-1]
    y = jnp.einsum('bmn,bcn->bcm', att, g_r).reshape(B, cr, Nh)
    return _bn_ref(_conv1x1(y, p['ww'], p['bw']), p) + xh


def mfa_block_reference(x, x0, params):
    B, Ch, H, W = x.shape
    _, Cl, H0, W0 = x0.shape
    xh = x.reshape(B, Ch, H * W)
    xl = x0.reshape(B, Cl, H0 * W0)
    z = _ref_cnl(xh, xl, params['cnl'])
    z = _ref_pnl(z, xl, params['pnl'], Cl)
    return z.reshape(B, Ch, H, W)


# ----------------------------- main -------------------------------------------
if __name__ == "__main__":
    key = jax.random.PRNGKey(0)
    k_x, k_x0, k_p = jax.random.split(key, 3)

    B, high_dim, low_dim, H, W = 2, 8, 4, 8, 8
    x = jax.random.normal(k_x, (B, high_dim, H, W), jnp.float32)
    x0 = jax.random.normal(k_x0, (B, low_dim, H, W), jnp.float32)
    params = init_params(k_p, high_dim, low_dim)

    # 1) Default module init: BN weight/bias are 0 -> W_y vanishes and both
    #    blocks reduce to the residual identity.  With bf16 I/O the kernel must
    #    return exactly bf16(x): checks plumbing (padding/unpadding) exactly.
    out = jax.block_until_ready(mfa_block_forward(x, x0, params))
    assert out.shape == x.shape and out.dtype == jnp.bfloat16
    ident = x.astype(jnp.bfloat16).astype(jnp.float32)
    assert jnp.allclose(out.astype(jnp.float32), ident, rtol=1e-5, atol=1e-5), \
        "mismatch (identity path)"

    # 2) Non-zero BN affine params exercise the full attention math.  The kernel
    #    uses bf16 I/O and bf16 matmul operands (f32 accumulation), so compare
    #    against the f32 reference with a correspondingly looser tolerance.
    params_nz = {blk: dict(params[blk]) for blk in params}
    for blk in ('cnl', 'pnl'):
        params_nz[blk]['gamma'] = 0.5 * jnp.ones((high_dim,), jnp.float32)
        params_nz[blk]['beta'] = 0.1 * jnp.ones((high_dim,), jnp.float32)
    out_nz = jax.block_until_ready(mfa_block_forward(x, x0, params_nz))
    ref_nz = mfa_block_reference(x, x0, params_nz)
    assert jnp.allclose(out_nz.astype(jnp.float32), ref_nz, rtol=3e-2, atol=3e-2), \
        "mismatch (nonzero BN)"

    print("KERNEL_OK")
</pallas_src>

<mosaic_0001>
module attributes {stable_mosaic.version = 11 : i64} {
  func.func @mfa_fused_kernel(%arg0: i32, %arg1: memref<1x8x256xbf16, #tpu.memory_space<vmem>>, %arg2: memref<1x4x256xbf16, #tpu.memory_space<vmem>>, %arg3: memref<64x4xbf16, #tpu.memory_space<vmem>>, %arg4: memref<16x8xbf16, #tpu.memory_space<vmem>>, %arg5: memref<16x8xbf16, #tpu.memory_space<vmem>>, %arg6: memref<8x16xbf16, #tpu.memory_space<vmem>>, %arg7: memref<8x16xbf16, #tpu.memory_space<vmem>>, %arg8: memref<112x1xf32, #tpu.memory_space<vmem>>, %arg9: memref<1x8x256xbf16, #tpu.memory_space<vmem>>) attributes {dimension_semantics = [#tpu.dimension_semantics<parallel>], iteration_bounds = array<i64: 2>, scalar_prefetch = 0 : i64, scratch_operands = 0 : i64, tpu.core_type = #tpu.core_type<tc>, window_params = [{transform_indices = @transform_0, window_bounds = array<i64: 1, 8, 256>}, {transform_indices = @transform_1, window_bounds = array<i64: 1, 4, 256>}, {pipeline_mode = #tpu.pipeline_mode<synchronous>, transform_indices = @transform_2, window_bounds = array<i64: 64, 4>}, {pipeline_mode = #tpu.pipeline_mode<synchronous>, transform_indices = @transform_3, window_bounds = array<i64: 16, 8>}, {pipeline_mode = #tpu.pipeline_mode<synchronous>, transform_indices = @transform_4, window_bounds = array<i64: 16, 8>}, {pipeline_mode = #tpu.pipeline_mode<synchronous>, transform_indices = @transform_5, window_bounds = array<i64: 8, 16>}, {pipeline_mode = #tpu.pipeline_mode<synchronous>, transform_indices = @transform_6, window_bounds = array<i64: 8, 16>}, {pipeline_mode = #tpu.pipeline_mode<synchronous>, transform_indices = @transform_7, window_bounds = array<i64: 112, 1>}, {transform_indices = @transform_8, window_bounds = array<i64: 1, 8, 256>}]} {
    %c0 = arith.constant 0 : index
    %c0_0 = arith.constant 0 : index
    %c0_1 = arith.constant 0 : index
    %0 = vector.load %arg1[%c0, %c0_0, %c0_1] : memref<1x8x256xbf16, #tpu.memory_space<vmem>>, vector<1x8x256xbf16>
    %1 = vector.shape_cast %0 : vector<1x8x256xbf16> to vector<8x256xbf16>
    %c0_2 = arith.constant 0 : index
    %c0_3 = arith.constant 0 : index
    %c0_4 = arith.constant 0 : index
    %2 = vector.load %arg2[%c0_2, %c0_3, %c0_4] : memref<1x4x256xbf16, #tpu.memory_space<vmem>>, vector<1x4x256xbf16>
    %3 = vector.shape_cast %2 : vector<1x4x256xbf16> to vector<4x256xbf16>
    %c0_5 = arith.constant 0 : index
    %c0_6 = arith.constant 0 : index
    %4 = vector.load %arg8[%c0_5, %c0_6] : memref<112x1xf32, #tpu.memory_space<vmem>>, vector<112x1xf32>
    %5 = vector.extract_strided_slice %4 {offsets = [0, 0], sizes = [64, 1], strides = [1, 1]} : vector<112x1xf32> to vector<64x1xf32>
    %6 = vector.extract_strided_slice %4 {offsets = [64, 0], sizes = [16, 1], strides = [1, 1]} : vector<112x1xf32> to vector<16x1xf32>
    %7 = vector.extract_strided_slice %4 {offsets = [80, 0], sizes = [16, 1], strides = [1, 1]} : vector<112x1xf32> to vector<16x1xf32>
    %8 = vector.extract_strided_slice %4 {offsets = [96, 0], sizes = [8, 1], strides = [1, 1]} : vector<112x1xf32> to vector<8x1xf32>
    %9 = vector.extract_strided_slice %4 {offsets = [104, 0], sizes = [8, 1], strides = [1, 1]} : vector<112x1xf32> to vector<8x1xf32>
    %c0_7 = arith.constant 0 : index
    %c0_8 = arith.constant 0 : index
    %10 = vector.load %arg3[%c0_7, %c0_8] : memref<64x4xbf16, #tpu.memory_space<vmem>>, vector<64x4xbf16>
    %cst = arith.constant dense<0.000000e+00> : vector<64x256xf32>
    %11 = tpu.matmul %10, %3, %cst {dimension_numbers = #tpu.dot_dimension_numbers<[1], [0], [0], [1], [0, 0, 1, 1], [], []>} : vector<64x4xbf16>, vector<4x256xbf16>, vector<64x256xf32> -> vector<64x256xf32>
    %12 = vector.broadcast %5 : vector<64x1xf32> to vector<64x256xf32>
    %13 = arith.addf %11, %12 : vector<64x256xf32>
    %14 = vector.extract_strided_slice %13 {offsets = [0, 0], sizes = [16, 256], strides = [1, 1]} : vector<64x256xf32> to vector<16x256xf32>
    %15 = vector.extract_strided_slice %13 {offsets = [16, 0], sizes = [16, 256], strides = [1, 1]} : vector<64x256xf32> to vector<16x256xf32>
    %16 = vector.extract_strided_slice %13 {offsets = [32, 0], sizes = [16, 256], strides = [1, 1]} : vector<64x256xf32> to vector<16x256xf32>
    %17 = vector.extract_strided_slice %13 {offsets = [48, 0], sizes = [16, 256], strides = [1, 1]} : vector<64x256xf32> to vector<16x256xf32>
    %18 = tpu.iota {dimensions = array<i32: 1>} : vector<1x128xi32>
    %c32_i32 = arith.constant 32 : i32
    %19 = vector.broadcast %c32_i32 : i32 to vector<1x128xi32>
    %20 = arith.cmpi slt, %18, %19 : vector<1x128xi32>
    %21 = arith.extui %20 : vector<1x128xi1> to vector<1x128xi32>
    %22 = arith.sitofp %21 : vector<1x128xi32> to vector<1x128xf32>
    %23 = tpu.concatenate %22, %22 in 1 : vector<1x128xf32>, vector<1x128xf32> -> vector<1x256xf32>
    %24 = vector.broadcast %23 : vector<1x256xf32> to vector<16x256xf32>
    %25 = arith.mulf %15, %24 : vector<16x256xf32>
    %26 = vector.broadcast %23 : vector<1x256xf32> to vector<16x256xf32>
    %27 = arith.mulf %17, %26 : vector<16x256xf32>
    %c0_9 = arith.constant 0 : index
    %c0_10 = arith.constant 0 : index
    %28 = vector.load %arg4[%c0_9, %c0_10] : memref<16x8xbf16, #tpu.memory_space<vmem>>, vector<16x8xbf16>
    %cst_11 = arith.constant dense<0.000000e+00> : vector<16x256xf32>
    %29 = tpu.matmul %28, %1, %cst_11 {dimension_numbers = #tpu.dot_dimension_numbers<[1], [0], [0], [1], [0, 0, 1, 1], [], []>} : vector<16x8xbf16>, vector<8x256xbf16>, vector<16x256xf32> -> vector<16x256xf32>
    %30 = vector.broadcast %6 : vector<16x1xf32> to vector<16x256xf32>
    %31 = arith.addf %29, %30 : vector<16x256xf32>
    %32 = arith.truncf %31 : vector<16x256xf32> to vector<16x256xbf16>
    %33 = arith.truncf %25 : vector<16x256xf32> to vector<16x256xbf16>
    %cst_12 = arith.constant dense<0.000000e+00> : vector<16x16xf32>
    %34 = tpu.matmul %32, %33, %cst_12 {dimension_numbers = #tpu.dot_dimension_numbers<[1], [1], [0], [0], [0, 0, 1, 0], [], []>} : vector<16x256xbf16>, vector<16x256xbf16>, vector<16x16xf32> -> vector<16x16xf32>
    %35 = arith.truncf %34 : vector<16x16xf32> to vector<16x16xbf16>
    %36 = arith.truncf %14 : vector<16x256xf32> to vector<16x256xbf16>
    %cst_13 = arith.constant dense<0.000000e+00> : vector<16x256xf32>
    %37 = tpu.matmul %35, %36, %cst_13 {dimension_numbers = #tpu.dot_dimension_numbers<[1], [0], [0], [1], [0, 0, 1, 1], [], []>} : vector<16x16xbf16>, vector<16x256xbf16>, vector<16x256xf32> -> vector<16x256xf32>
    %c0_14 = arith.constant 0 : index
    %c0_15 = arith.constant 0 : index
    %38 = vector.load %arg6[%c0_14, %c0_15] : memref<8x16xbf16, #tpu.memory_space<vmem>>, vector<8x16xbf16>
    %39 = arith.truncf %37 : vector<16x256xf32> to vector<16x256xbf16>
    %cst_16 = arith.constant dense<0.000000e+00> : vector<8x256xf32>
    %40 = tpu.matmul %38, %39, %cst_16 {dimension_numbers = #tpu.dot_dimension_numbers<[1], [0], [0], [1], [0, 0, 1, 1], [], []>} : vector<8x16xbf16>, vector<16x256xbf16>, vector<8x256xf32> -> vector<8x256xf32>
    %41 = vector.broadcast %8 : vector<8x1xf32> to vector<8x256xf32>
    %42 = arith.addf %40, %41 : vector<8x256xf32>
    %43 = arith.extf %1 : vector<8x256xbf16> to vector<8x256xf32>
    %44 = arith.addf %42, %43 : vector<8x256xf32>
    %c0_17 = arith.constant 0 : index
    %c0_18 = arith.constant 0 : index
    %45 = vector.load %arg5[%c0_17, %c0_18] : memref<16x8xbf16, #tpu.memory_space<vmem>>, vector<16x8xbf16>
    %46 = arith.truncf %44 : vector<8x256xf32> to vector<8x256xbf16>
    %cst_19 = arith.constant dense<0.000000e+00> : vector<16x256xf32>
    %47 = tpu.matmul %45, %46, %cst_19 {dimension_numbers = #tpu.dot_dimension_numbers<[1], [0], [0], [1], [0, 0, 1, 1], [], []>} : vector<16x8xbf16>, vector<8x256xbf16>, vector<16x256xf32> -> vector<16x256xf32>
    %48 = vector.broadcast %7 : vector<16x1xf32> to vector<16x256xf32>
    %49 = arith.addf %47, %48 : vector<16x256xf32>
    %50 = arith.truncf %49 : vector<16x256xf32> to vector<16x256xbf16>
    %51 = arith.truncf %16 : vector<16x256xf32> to vector<16x256xbf16>
    %52 = arith.truncf %27 : vector<16x256xf32> to vector<16x256xbf16>
    %c0_20 = arith.constant 0 : index
    %c0_21 = arith.constant 0 : index
    %53 = vector.load %arg7[%c0_20, %c0_21] : memref<8x16xbf16, #tpu.memory_space<vmem>>, vector<8x16xbf16>
    %54 = vector.extract_strided_slice %51 {offsets = [0, 0], sizes = [16, 128], strides = [1, 1]} : vector<16x256xbf16> to vector<16x128xbf16>
    %55 = vector.extract_strided_slice %52 {offsets = [0, 0], sizes = [16, 128], strides = [1, 1]} : vector<16x256xbf16> to vector<16x128xbf16>
    %cst_22 = arith.constant dense<0.000000e+00> : vector<16x16xf32>
    %56 = tpu.matmul %54, %55, %cst_22 {dimension_numbers = #tpu.dot_dimension_numbers<[1], [1], [0], [0], [0, 0, 1, 0], [], []>} : vector<16x128xbf16>, vector<16x128xbf16>, vector<16x16xf32> -> vector<16x16xf32>
    %57 = vector.extract_strided_slice %50 {offsets = [0, 0], sizes = [16, 128], strides = [1, 1]} : vector<16x256xbf16> to vector<16x128xbf16>
    %58 = arith.truncf %56 : vector<16x16xf32> to vector<16x16xbf16>
    %cst_23 = arith.constant dense<0.000000e+00> : vector<16x128xf32>
    %59 = tpu.matmul %58, %57, %cst_23 {dimension_numbers = #tpu.dot_dimension_numbers<[1], [0], [0], [1], [0, 0, 1, 1], [], []>} : vector<16x16xbf16>, vector<16x128xbf16>, vector<16x128xf32> -> vector<16x128xf32>
    %60 = vector.extract_strided_slice %52 {offsets = [0, 128], sizes = [16, 128], strides = [1, 1]} : vector<16x256xbf16> to vector<16x128xbf16>
    %cst_24 = arith.constant dense<0.000000e+00> : vector<16x16xf32>
    %61 = tpu.matmul %54, %60, %cst_24 {dimension_numbers = #tpu.dot_dimension_numbers<[1], [1], [0], [0], [0, 0, 1, 0], [], []>} : vector<16x128xbf16>, vector<16x128xbf16>, vector<16x16xf32> -> vector<16x16xf32>
    %62 = vector.extract_strided_slice %50 {offsets = [0, 128], sizes = [16, 128], strides = [1, 1]} : vector<16x256xbf16> to vector<16x128xbf16>
    %63 = arith.truncf %61 : vector<16x16xf32> to vector<16x16xbf16>
    %cst_25 = arith.constant dense<0.000000e+00> : vector<16x128xf32>
    %64 = tpu.matmul %63, %62, %cst_25 {dimension_numbers = #tpu.dot_dimension_numbers<[1], [0], [0], [1], [0, 0, 1, 1], [], []>} : vector<16x16xbf16>, vector<16x128xbf16>, vector<16x128xf32> -> vector<16x128xf32>
    %65 = arith.addf %59, %64 : vector<16x128xf32>
    %66 = arith.truncf %65 : vector<16x128xf32> to vector<16x128xbf16>
    %cst_26 = arith.constant dense<0.000000e+00> : vector<8x128xf32>
    %67 = tpu.matmul %53, %66, %cst_26 {dimension_numbers = #tpu.dot_dimension_numbers<[1], [0], [0], [1], [0, 0, 1, 1], [], []>} : vector<8x16xbf16>, vector<16x128xbf16>, vector<8x128xf32> -> vector<8x128xf32>
    %68 = vector.broadcast %9 : vector<8x1xf32> to vector<8x128xf32>
    %69 = arith.addf %67, %68 : vector<8x128xf32>
    %70 = vector.extract_strided_slice %44 {offsets = [0, 0], sizes = [8, 128], strides = [1, 1]} : vector<8x256xf32> to vector<8x128xf32>
    %71 = arith.addf %69, %70 : vector<8x128xf32>
    %72 = arith.truncf %71 : vector<8x128xf32> to vector<8x128xbf16>
    %c0_27 = arith.constant 0 : index
    %c0_28 = arith.constant 0 : index
    %c0_29 = arith.constant 0 : index
    %73 = vector.load %arg9[%c0_27, %c0_28, %c0_29] : memref<1x8x256xbf16, #tpu.memory_space<vmem>>, vector<1x8x128xbf16>
    %74 = vector.shape_cast %73 : vector<1x8x128xbf16> to vector<8x128xbf16>
    %75 = vector.shape_cast %72 : vector<8x128xbf16> to vector<1x8x128xbf16>
    tpu.vector_store %arg9[%c0_27, %c0_28, %c0_29], %75 {strides = array<i32>} : memref<1x8x256xbf16, #tpu.memory_space<vmem>>, vector<1x8x128xbf16>,
    %76 = vector.extract_strided_slice %51 {offsets = [0, 128], sizes = [16, 128], strides = [1, 1]} : vector<16x256xbf16> to vector<16x128xbf16>
    %77 = vector.extract_strided_slice %52 {offsets = [0, 0], sizes = [16, 128], strides = [1, 1]} : vector<16x256xbf16> to vector<16x128xbf16>
    %cst_30 = arith.constant dense<0.000000e+00> : vector<16x16xf32>
    %78 = tpu.matmul %76, %77, %cst_30 {dimension_numbers = #tpu.dot_dimension_numbers<[1], [1], [0], [0], [0, 0, 1, 0], [], []>} : vector<16x128xbf16>, vector<16x128xbf16>, vector<16x16xf32> -> vector<16x16xf32>
    %79 = vector.extract_strided_slice %50 {offsets = [0, 0], sizes = [16, 128], strides = [1, 1]} : vector<16x256xbf16> to vector<16x128xbf16>
    %80 = arith.truncf %78 : vector<16x16xf32> to vector<16x16xbf16>
    %cst_31 = arith.constant dense<0.000000e+00> : vector<16x128xf32>
    %81 = tpu.matmul %80, %79, %cst_31 {dimension_numbers = #tpu.dot_dimension_numbers<[1], [0], [0], [1], [0, 0, 1, 1], [], []>} : vector<16x16xbf16>, vector<16x128xbf16>, vector<16x128xf32> -> vector<16x128xf32>
    %82 = vector.extract_strided_slice %52 {offsets = [0, 128], sizes = [16, 128], strides = [1, 1]} : vector<16x256xbf16> to vector<16x128xbf16>
    %cst_32 = arith.constant dense<0.000000e+00> : vector<16x16xf32>
    %83 = tpu.matmul %76, %82, %cst_32 {dimension_numbers = #tpu.dot_dimension_numbers<[1], [1], [0], [0], [0, 0, 1, 0], [], []>} : vector<16x128xbf16>, vector<16x128xbf16>, vector<16x16xf32> -> vector<16x16xf32>
    %84 = vector.extract_strided_slice %50 {offsets = [0, 128], sizes = [16, 128], strides = [1, 1]} : vector<16x256xbf16> to vector<16x128xbf16>
    %85 = arith.truncf %83 : vector<16x16xf32> to vector<16x16xbf16>
    %cst_33 = arith.constant dense<0.000000e+00> : vector<16x128xf32>
    %86 = tpu.matmul %85, %84, %cst_33 {dimension_numbers = #tpu.dot_dimension_numbers<[1], [0], [0], [1], [0, 0, 1, 1], [], []>} : vector<16x16xbf16>, vector<16x128xbf16>, vector<16x128xf32> -> vector<16x128xf32>
    %87 = arith.addf %81, %86 : vector<16x128xf32>
    %88 = arith.truncf %87 : vector<16x128xf32> to vector<16x128xbf16>
    %cst_34 = arith.constant dense<0.000000e+00> : vector<8x128xf32>
    %89 = tpu.matmul %53, %88, %cst_34 {dimension_numbers = #tpu.dot_dimension_numbers<[1], [0], [0], [1], [0, 0, 1, 1], [], []>} : vector<8x16xbf16>, vector<16x128xbf16>, vector<8x128xf32> -> vector<8x128xf32>
    %90 = vector.broadcast %9 : vector<8x1xf32> to vector<8x128xf32>
    %91 = arith.addf %89, %90 : vector<8x128xf32>
    %92 = vector.extract_strided_slice %44 {offsets = [0, 128], sizes = [8, 128], strides = [1, 1]} : vector<8x256xf32> to vector<8x128xf32>
    %93 = arith.addf %91, %92 : vector<8x128xf32>
    %94 = arith.truncf %93 : vector<8x128xf32> to vector<8x128xbf16>
    %c0_35 = arith.constant 0 : index
    %c0_36 = arith.constant 0 : index
    %c128 = arith.constant 128 : index
    %95 = vector.load %arg9[%c0_35, %c0_36, %c128] : memref<1x8x256xbf16, #tpu.memory_space<vmem>>, vector<1x8x128xbf16>
    %96 = vector.shape_cast %95 : vector<1x8x128xbf16> to vector<8x128xbf16>
    %97 = vector.shape_cast %94 : vector<8x128xbf16> to vector<1x8x128xbf16>
    tpu.vector_store %arg9[%c0_35, %c0_36, %c128], %97 {strides = array<i32>} : memref<1x8x256xbf16, #tpu.memory_space<vmem>>, vector<1x8x128xbf16>,
    return
  }
  func.func @transform_0(%arg0: i32) -> (i32, i32, i32) {
    %c0_i32 = arith.constant 0 : i32
    %c0_i32_0 = arith.constant 0 : i32
    %c0_i32_1 = arith.constant 0 : i32
    return %arg0, %c0_i32, %c0_i32_0 : i32, i32, i32
  }
  func.func @transform_1(%arg0: i32) -> (i32, i32, i32) {
    %c0_i32 = arith.constant 0 : i32
    %c0_i32_0 = arith.constant 0 : i32
    %c0_i32_1 = arith.constant 0 : i32
    return %arg0, %c0_i32, %c0_i32_0 : i32, i32, i32
  }
  func.func @transform_2(%arg0: i32) -> (i32, i32) {
    %c0_i32 = arith.constant 0 : i32
    %c0_i32_0 = arith.constant 0 : i32
    %c0_i32_1 = arith.constant 0 : i32
    return %c0_i32, %c0_i32_0 : i32, i32
  }
  func.func @transform_3(%arg0: i32) -> (i32, i32) {
    %c0_i32 = arith.constant 0 : i32
    %c0_i32_0 = arith.constant 0 : i32
    %c0_i32_1 = arith.constant 0 : i32
    return %c0_i32, %c0_i32_0 : i32, i32
  }
  func.func @transform_4(%arg0: i32) -> (i32, i32) {
    %c0_i32 = arith.constant 0 : i32
    %c0_i32_0 = arith.constant 0 : i32
    %c0_i32_1 = arith.constant 0 : i32
    return %c0_i32, %c0_i32_0 : i32, i32
  }
  func.func @transform_5(%arg0: i32) -> (i32, i32) {
    %c0_i32 = arith.constant 0 : i32
    %c0_i32_0 = arith.constant 0 : i32
    %c0_i32_1 = arith.constant 0 : i32
    return %c0_i32, %c0_i32_0 : i32, i32
  }
  func.func @transform_6(%arg0: i32) -> (i32, i32) {
    %c0_i32 = arith.constant 0 : i32
    %c0_i32_0 = arith.constant 0 : i32
    %c0_i32_1 = arith.constant 0 : i32
    return %c0_i32, %c0_i32_0 : i32, i32
  }
  func.func @transform_7(%arg0: i32) -> (i32, i32) {
    %c0_i32 = arith.constant 0 : i32
    %c0_i32_0 = arith.constant 0 : i32
    %c0_i32_1 = arith.constant 0 : i32
    return %c0_i32, %c0_i32_0 : i32, i32
  }
  func.func @transform_8(%arg0: i32) -> (i32, i32, i32) {
    %c0_i32 = arith.constant 0 : i32
    %c0_i32_0 = arith.constant 0 : i32
    %c0_i32_1 = arith.constant 0 : i32
    return %arg0, %c0_i32, %c0_i32_0 : i32, i32, i32
  }
}

module attributes {stable_mosaic.version = 11 : i64} {
  func.func @mfa_fused_kernel(%arg0: i32, %arg1: memref<1x8x256xbf16, #tpu.memory_space<vmem>>, %arg2: memref<1x4x256xbf16, #tpu.memory_space<vmem>>, %arg3: memref<64x4xbf16, #tpu.memory_space<vmem>>, %arg4: memref<16x8xbf16, #tpu.memory_space<vmem>>, %arg5: memref<16x8xbf16, #tpu.memory_space<vmem>>, %arg6: memref<8x16xbf16, #tpu.memory_space<vmem>>, %arg7: memref<8x16xbf16, #tpu.memory_space<vmem>>, %arg8: memref<112x1xf32, #tpu.memory_space<vmem>>, %arg9: memref<1x8x256xbf16, #tpu.memory_space<vmem>>) attributes {dimension_semantics = [#tpu.dimension_semantics<parallel>], iteration_bounds = array<i64: 2>, scalar_prefetch = 0 : i64, scratch_operands = 0 : i64, tpu.core_type = #tpu.core_type<tc>, window_params = [{transform_indices = @transform_0, window_bounds = array<i64: 1, 8, 256>}, {transform_indices = @transform_1, window_bounds = array<i64: 1, 4, 256>}, {pipeline_mode = #tpu.pipeline_mode<synchronous>, transform_indices = @transform_2, window_bounds = array<i64: 64, 4>}, {pipeline_mode = #tpu.pipeline_mode<synchronous>, transform_indices = @transform_3, window_bounds = array<i64: 16, 8>}, {pipeline_mode = #tpu.pipeline_mode<synchronous>, transform_indices = @transform_4, window_bounds = array<i64: 16, 8>}, {pipeline_mode = #tpu.pipeline_mode<synchronous>, transform_indices = @transform_5, window_bounds = array<i64: 8, 16>}, {pipeline_mode = #tpu.pipeline_mode<synchronous>, transform_indices = @transform_6, window_bounds = array<i64: 8, 16>}, {pipeline_mode = #tpu.pipeline_mode<synchronous>, transform_indices = @transform_7, window_bounds = array<i64: 112, 1>}, {transform_indices = @transform_8, window_bounds = array<i64: 1, 8, 256>}]} {
    %c0 = arith.constant 0 : index
    %c0_0 = arith.constant 0 : index
    %c0_1 = arith.constant 0 : index
    %0 = vector.load %arg1[%c0, %c0_0, %c0_1] : memref<1x8x256xbf16, #tpu.memory_space<vmem>>, vector<1x8x256xbf16>
    %1 = vector.shape_cast %0 : vector<1x8x256xbf16> to vector<8x256xbf16>
    %c0_2 = arith.constant 0 : index
    %c0_3 = arith.constant 0 : index
    %c0_4 = arith.constant 0 : index
    %2 = vector.load %arg2[%c0_2, %c0_3, %c0_4] : memref<1x4x256xbf16, #tpu.memory_space<vmem>>, vector<1x4x256xbf16>
    %3 = vector.shape_cast %2 : vector<1x4x256xbf16> to vector<4x256xbf16>
    %c0_5 = arith.constant 0 : index
    %c0_6 = arith.constant 0 : index
    %4 = vector.load %arg8[%c0_5, %c0_6] : memref<112x1xf32, #tpu.memory_space<vmem>>, vector<112x1xf32>
    %5 = vector.extract_strided_slice %4 {offsets = [0, 0], sizes = [64, 1], strides = [1, 1]} : vector<112x1xf32> to vector<64x1xf32>
    %6 = vector.extract_strided_slice %4 {offsets = [64, 0], sizes = [16, 1], strides = [1, 1]} : vector<112x1xf32> to vector<16x1xf32>
    %7 = vector.extract_strided_slice %4 {offsets = [80, 0], sizes = [16, 1], strides = [1, 1]} : vector<112x1xf32> to vector<16x1xf32>
    %8 = vector.extract_strided_slice %4 {offsets = [96, 0], sizes = [8, 1], strides = [1, 1]} : vector<112x1xf32> to vector<8x1xf32>
    %9 = vector.extract_strided_slice %4 {offsets = [104, 0], sizes = [8, 1], strides = [1, 1]} : vector<112x1xf32> to vector<8x1xf32>
    %c0_7 = arith.constant 0 : index
    %c0_8 = arith.constant 0 : index
    %10 = vector.load %arg3[%c0_7, %c0_8] : memref<64x4xbf16, #tpu.memory_space<vmem>>, vector<64x4xbf16>
    %cst = arith.constant dense<0.000000e+00> : vector<64x256xf32>
    %11 = tpu.matmul %10, %3, %cst {dimension_numbers = #tpu.dot_dimension_numbers<[1], [0], [0], [1], [0, 0, 1, 1], [], []>} : vector<64x4xbf16>, vector<4x256xbf16>, vector<64x256xf32> -> vector<64x256xf32>
    %12 = vector.broadcast %5 : vector<64x1xf32> to vector<64x256xf32>
    %13 = arith.addf %11, %12 : vector<64x256xf32>
    %14 = vector.extract_strided_slice %13 {offsets = [0, 0], sizes = [16, 256], strides = [1, 1]} : vector<64x256xf32> to vector<16x256xf32>
    %15 = vector.extract_strided_slice %13 {offsets = [16, 0], sizes = [16, 256], strides = [1, 1]} : vector<64x256xf32> to vector<16x256xf32>
    %16 = vector.extract_strided_slice %13 {offsets = [32, 0], sizes = [16, 256], strides = [1, 1]} : vector<64x256xf32> to vector<16x256xf32>
    %17 = vector.extract_strided_slice %13 {offsets = [48, 0], sizes = [16, 256], strides = [1, 1]} : vector<64x256xf32> to vector<16x256xf32>
    %18 = tpu.iota {dimensions = array<i32: 1>} : vector<1x128xi32>
    %c32_i32 = arith.constant 32 : i32
    %19 = vector.broadcast %c32_i32 : i32 to vector<1x128xi32>
    %20 = arith.cmpi slt, %18, %19 : vector<1x128xi32>
    %21 = arith.extui %20 : vector<1x128xi1> to vector<1x128xi32>
    %22 = arith.sitofp %21 : vector<1x128xi32> to vector<1x128xf32>
    %23 = tpu.concatenate %22, %22 in 1 : vector<1x128xf32>, vector<1x128xf32> -> vector<1x256xf32>
    %24 = vector.broadcast %23 : vector<1x256xf32> to vector<16x256xf32>
    %25 = arith.mulf %15, %24 : vector<16x256xf32>
    %26 = vector.broadcast %23 : vector<1x256xf32> to vector<16x256xf32>
    %27 = arith.mulf %17, %26 : vector<16x256xf32>
    %c0_9 = arith.constant 0 : index
    %c0_10 = arith.constant 0 : index
    %28 = vector.load %arg4[%c0_9, %c0_10] : memref<16x8xbf16, #tpu.memory_space<vmem>>, vector<16x8xbf16>
    %cst_11 = arith.constant dense<0.000000e+00> : vector<16x256xf32>
    %29 = tpu.matmul %28, %1, %cst_11 {dimension_numbers = #tpu.dot_dimension_numbers<[1], [0], [0], [1], [0, 0, 1, 1], [], []>} : vector<16x8xbf16>, vector<8x256xbf16>, vector<16x256xf32> -> vector<16x256xf32>
    %30 = vector.broadcast %6 : vector<16x1xf32> to vector<16x256xf32>
    %31 = arith.addf %29, %30 : vector<16x256xf32>
    %32 = arith.truncf %31 : vector<16x256xf32> to vector<16x256xbf16>
    %33 = arith.truncf %25 : vector<16x256xf32> to vector<16x256xbf16>
    %cst_12 = arith.constant dense<0.000000e+00> : vector<16x16xf32>
    %34 = tpu.matmul %32, %33, %cst_12 {dimension_numbers = #tpu.dot_dimension_numbers<[1], [1], [0], [0], [0, 0, 1, 0], [], []>} : vector<16x256xbf16>, vector<16x256xbf16>, vector<16x16xf32> -> vector<16x16xf32>
    %35 = arith.truncf %34 : vector<16x16xf32> to vector<16x16xbf16>
    %36 = arith.truncf %14 : vector<16x256xf32> to vector<16x256xbf16>
    %cst_13 = arith.constant dense<0.000000e+00> : vector<16x256xf32>
    %37 = tpu.matmul %35, %36, %cst_13 {dimension_numbers = #tpu.dot_dimension_numbers<[1], [0], [0], [1], [0, 0, 1, 1], [], []>} : vector<16x16xbf16>, vector<16x256xbf16>, vector<16x256xf32> -> vector<16x256xf32>
    %c0_14 = arith.constant 0 : index
    %c0_15 = arith.constant 0 : index
    %38 = vector.load %arg6[%c0_14, %c0_15] : memref<8x16xbf16, #tpu.memory_space<vmem>>, vector<8x16xbf16>
    %39 = arith.truncf %37 : vector<16x256xf32> to vector<16x256xbf16>
    %cst_16 = arith.constant dense<0.000000e+00> : vector<8x256xf32>
    %40 = tpu.matmul %38, %39, %cst_16 {dimension_numbers = #tpu.dot_dimension_numbers<[1], [0], [0], [1], [0, 0, 1, 1], [], []>} : vector<8x16xbf16>, vector<16x256xbf16>, vector<8x256xf32> -> vector<8x256xf32>
    %41 = vector.broadcast %8 : vector<8x1xf32> to vector<8x256xf32>
    %42 = arith.addf %40, %41 : vector<8x256xf32>
    %43 = arith.extf %1 : vector<8x256xbf16> to vector<8x256xf32>
    %44 = arith.addf %42, %43 : vector<8x256xf32>
    %c0_17 = arith.constant 0 : index
    %c0_18 = arith.constant 0 : index
    %45 = vector.load %arg5[%c0_17, %c0_18] : memref<16x8xbf16, #tpu.memory_space<vmem>>, vector<16x8xbf16>
    %46 = arith.truncf %44 : vector<8x256xf32> to vector<8x256xbf16>
    %cst_19 = arith.constant dense<0.000000e+00> : vector<16x256xf32>
    %47 = tpu.matmul %45, %46, %cst_19 {dimension_numbers = #tpu.dot_dimension_numbers<[1], [0], [0], [1], [0, 0, 1, 1], [], []>} : vector<16x8xbf16>, vector<8x256xbf16>, vector<16x256xf32> -> vector<16x256xf32>
    %48 = vector.broadcast %7 : vector<16x1xf32> to vector<16x256xf32>
    %49 = arith.addf %47, %48 : vector<16x256xf32>
    %50 = arith.truncf %49 : vector<16x256xf32> to vector<16x256xbf16>
    %51 = arith.truncf %16 : vector<16x256xf32> to vector<16x256xbf16>
    %52 = arith.truncf %27 : vector<16x256xf32> to vector<16x256xbf16>
    %c0_20 = arith.constant 0 : index
    %c0_21 = arith.constant 0 : index
    %53 = vector.load %arg7[%c0_20, %c0_21] : memref<8x16xbf16, #tpu.memory_space<vmem>>, vector<8x16xbf16>
    %54 = vector.extract_strided_slice %51 {offsets = [0, 0], sizes = [16, 128], strides = [1, 1]} : vector<16x256xbf16> to vector<16x128xbf16>
    %55 = vector.extract_strided_slice %52 {offsets = [0, 0], sizes = [16, 128], strides = [1, 1]} : vector<16x256xbf16> to vector<16x128xbf16>
    %cst_22 = arith.constant dense<0.000000e+00> : vector<16x16xf32>
    %56 = tpu.matmul %54, %55, %cst_22 {dimension_numbers = #tpu.dot_dimension_numbers<[1], [1], [0], [0], [0, 0, 1, 0], [], []>} : vector<16x128xbf16>, vector<16x128xbf16>, vector<16x16xf32> -> vector<16x16xf32>
    %57 = vector.extract_strided_slice %50 {offsets = [0, 0], sizes = [16, 128], strides = [1, 1]} : vector<16x256xbf16> to vector<16x128xbf16>
    %58 = arith.truncf %56 : vector<16x16xf32> to vector<16x16xbf16>
    %cst_23 = arith.constant dense<0.000000e+00> : vector<16x128xf32>
    %59 = tpu.matmul %58, %57, %cst_23 {dimension_numbers = #tpu.dot_dimension_numbers<[1], [0], [0], [1], [0, 0, 1, 1], [], []>} : vector<16x16xbf16>, vector<16x128xbf16>, vector<16x128xf32> -> vector<16x128xf32>
    %60 = vector.extract_strided_slice %52 {offsets = [0, 128], sizes = [16, 128], strides = [1, 1]} : vector<16x256xbf16> to vector<16x128xbf16>
    %cst_24 = arith.constant dense<0.000000e+00> : vector<16x16xf32>
    %61 = tpu.matmul %54, %60, %cst_24 {dimension_numbers = #tpu.dot_dimension_numbers<[1], [1], [0], [0], [0, 0, 1, 0], [], []>} : vector<16x128xbf16>, vector<16x128xbf16>, vector<16x16xf32> -> vector<16x16xf32>
    %62 = vector.extract_strided_slice %50 {offsets = [0, 128], sizes = [16, 128], strides = [1, 1]} : vector<16x256xbf16> to vector<16x128xbf16>
    %63 = arith.truncf %61 : vector<16x16xf32> to vector<16x16xbf16>
    %cst_25 = arith.constant dense<0.000000e+00> : vector<16x128xf32>
    %64 = tpu.matmul %63, %62, %cst_25 {dimension_numbers = #tpu.dot_dimension_numbers<[1], [0], [0], [1], [0, 0, 1, 1], [], []>} : vector<16x16xbf16>, vector<16x128xbf16>, vector<16x128xf32> -> vector<16x128xf32>
    %65 = arith.addf %59, %64 : vector<16x128xf32>
    %66 = arith.truncf %65 : vector<16x128xf32> to vector<16x128xbf16>
    %cst_26 = arith.constant dense<0.000000e+00> : vector<8x128xf32>
    %67 = tpu.matmul %53, %66, %cst_26 {dimension_numbers = #tpu.dot_dimension_numbers<[1], [0], [0], [1], [0, 0, 1, 1], [], []>} : vector<8x16xbf16>, vector<16x128xbf16>, vector<8x128xf32> -> vector<8x128xf32>
    %68 = vector.broadcast %9 : vector<8x1xf32> to vector<8x128xf32>
    %69 = arith.addf %67, %68 : vector<8x128xf32>
    %70 = vector.extract_strided_slice %44 {offsets = [0, 0], sizes = [8, 128], strides = [1, 1]} : vector<8x256xf32> to vector<8x128xf32>
    %71 = arith.addf %69, %70 : vector<8x128xf32>
    %72 = arith.truncf %71 : vector<8x128xf32> to vector<8x128xbf16>
    %c0_27 = arith.constant 0 : index
    %c0_28 = arith.constant 0 : index
    %c0_29 = arith.constant 0 : index
    %73 = vector.load %arg9[%c0_27, %c0_28, %c0_29] : memref<1x8x256xbf16, #tpu.memory_space<vmem>>, vector<1x8x128xbf16>
    %74 = vector.shape_cast %73 : vector<1x8x128xbf16> to vector<8x128xbf16>
    %75 = vector.shape_cast %72 : vector<8x128xbf16> to vector<1x8x128xbf16>
    tpu.vector_store %arg9[%c0_27, %c0_28, %c0_29], %75 {strides = array<i32>} : memref<1x8x256xbf16, #tpu.memory_space<vmem>>, vector<1x8x128xbf16>,
    %76 = vector.extract_strided_slice %51 {offsets = [0, 128], sizes = [16, 128], strides = [1, 1]} : vector<16x256xbf16> to vector<16x128xbf16>
    %77 = vector.extract_strided_slice %52 {offsets = [0, 0], sizes = [16, 128], strides = [1, 1]} : vector<16x256xbf16> to vector<16x128xbf16>
    %cst_30 = arith.constant dense<0.000000e+00> : vector<16x16xf32>
    %78 = tpu.matmul %76, %77, %cst_30 {dimension_numbers = #tpu.dot_dimension_numbers<[1], [1], [0], [0], [0, 0, 1, 0], [], []>} : vector<16x128xbf16>, vector<16x128xbf16>, vector<16x16xf32> -> vector<16x16xf32>
    %79 = vector.extract_strided_slice %50 {offsets = [0, 0], sizes = [16, 128], strides = [1, 1]} : vector<16x256xbf16> to vector<16x128xbf16>
    %80 = arith.truncf %78 : vector<16x16xf32> to vector<16x16xbf16>
    %cst_31 = arith.constant dense<0.000000e+00> : vector<16x128xf32>
    %81 = tpu.matmul %80, %79, %cst_31 {dimension_numbers = #tpu.dot_dimension_numbers<[1], [0], [0], [1], [0, 0, 1, 1], [], []>} : vector<16x16xbf16>, vector<16x128xbf16>, vector<16x128xf32> -> vector<16x128xf32>
    %82 = vector.extract_strided_slice %52 {offsets = [0, 128], sizes = [16, 128], strides = [1, 1]} : vector<16x256xbf16> to vector<16x128xbf16>
    %cst_32 = arith.constant dense<0.000000e+00> : vector<16x16xf32>
    %83 = tpu.matmul %76, %82, %cst_32 {dimension_numbers = #tpu.dot_dimension_numbers<[1], [1], [0], [0], [0, 0, 1, 0], [], []>} : vector<16x128xbf16>, vector<16x128xbf16>, vector<16x16xf32> -> vector<16x16xf32>
    %84 = vector.extract_strided_slice %50 {offsets = [0, 128], sizes = [16, 128], strides = [1, 1]} : vector<16x256xbf16> to vector<16x128xbf16>
    %85 = arith.truncf %83 : vector<16x16xf32> to vector<16x16xbf16>
    %cst_33 = arith.constant dense<0.000000e+00> : vector<16x128xf32>
    %86 = tpu.matmul %85, %84, %cst_33 {dimension_numbers = #tpu.dot_dimension_numbers<[1], [0], [0], [1], [0, 0, 1, 1], [], []>} : vector<16x16xbf16>, vector<16x128xbf16>, vector<16x128xf32> -> vector<16x128xf32>
    %87 = arith.addf %81, %86 : vector<16x128xf32>
    %88 = arith.truncf %87 : vector<16x128xf32> to vector<16x128xbf16>
    %cst_34 = arith.constant dense<0.000000e+00> : vector<8x128xf32>
    %89 = tpu.matmul %53, %88, %cst_34 {dimension_numbers = #tpu.dot_dimension_numbers<[1], [0], [0], [1], [0, 0, 1, 1], [], []>} : vector<8x16xbf16>, vector<16x128xbf16>, vector<8x128xf32> -> vector<8x128xf32>
    %90 = vector.broadcast %9 : vector<8x1xf32> to vector<8x128xf32>
    %91 = arith.addf %89, %90 : vector<8x128xf32>
    %92 = vector.extract_strided_slice %44 {offsets = [0, 128], sizes = [8, 128], strides = [1, 1]} : vector<8x256xf32> to vector<8x128xf32>
    %93 = arith.addf %91, %92 : vector<8x128xf32>
    %94 = arith.truncf %93 : vector<8x128xf32> to vector<8x128xbf16>
    %c0_35 = arith.constant 0 : index
    %c0_36 = arith.constant 0 : index
    %c128 = arith.constant 128 : index
    %95 = vector.load %arg9[%c0_35, %c0_36, %c128] : memref<1x8x256xbf16, #tpu.memory_space<vmem>>, vector<1x8x128xbf16>
    %96 = vector.shape_cast %95 : vector<1x8x128xbf16> to vector<8x128xbf16>
    %97 = vector.shape_cast %94 : vector<8x128xbf16> to vector<1x8x128xbf16>
    tpu.vector_store %arg9[%c0_35, %c0_36, %c128], %97 {strides = array<i32>} : memref<1x8x256xbf16, #tpu.memory_space<vmem>>, vector<1x8x128xbf16>,
    return
  }
  func.func @transform_0(%arg0: i32) -> (i32, i32, i32) {
    %c0_i32 = arith.constant 0 : i32
    %c0_i32_0 = arith.constant 0 : i32
    %c0_i32_1 = arith.constant 0 : i32
    return %arg0, %c0_i32, %c0_i32_0 : i32, i32, i32
  }
  func.func @transform_1(%arg0: i32) -> (i32, i32, i32) {
    %c0_i32 = arith.constant 0 : i32
    %c0_i32_0 = arith.constant 0 : i32
    %c0_i32_1 = arith.constant 0 : i32
    return %arg0, %c0_i32, %c0_i32_0 : i32, i32, i32
  }
  func.func @transform_2(%arg0: i32) -> (i32, i32) {
    %c0_i32 = arith.constant 0 : i32
    %c0_i32_0 = arith.constant 0 : i32
    %c0_i32_1 = arith.constant 0 : i32
    return %c0_i32, %c0_i32_0 : i32, i32
  }
  func.func @transform_3(%arg0: i32) -> (i32, i32) {
    %c0_i32 = arith.constant 0 : i32
    %c0_i32_0 = arith.constant 0 : i32
    %c0_i32_1 = arith.constant 0 : i32
    return %c0_i32, %c0_i32_0 : i32, i32
  }
  func.func @transform_4(%arg0: i32) -> (i32, i32) {
    %c0_i32 = arith.constant 0 : i32
    %c0_i32_0 = arith.constant 0 : i32
    %c0_i32_1 = arith.constant 0 : i32
    return %c0_i32, %c0_i32_0 : i32, i32
  }
  func.func @transform_5(%arg0: i32) -> (i32, i32) {
    %c0_i32 = arith.constant 0 : i32
    %c0_i32_0 = arith.constant 0 : i32
    %c0_i32_1 = arith.constant 0 : i32
    return %c0_i32, %c0_i32_0 : i32, i32
  }
  func.func @transform_6(%arg0: i32) -> (i32, i32) {
    %c0_i32 = arith.constant 0 : i32
    %c0_i32_0 = arith.constant 0 : i32
    %c0_i32_1 = arith.constant 0 : i32
    return %c0_i32, %c0_i32_0 : i32, i32
  }
  func.func @transform_7(%arg0: i32) -> (i32, i32) {
    %c0_i32 = arith.constant 0 : i32
    %c0_i32_0 = arith.constant 0 : i32
    %c0_i32_1 = arith.constant 0 : i32
    return %c0_i32, %c0_i32_0 : i32, i32
  }
  func.func @transform_8(%arg0: i32) -> (i32, i32, i32) {
    %c0_i32 = arith.constant 0 : i32
    %c0_i32_0 = arith.constant 0 : i32
    %c0_i32_1 = arith.constant 0 : i32
    return %arg0, %c0_i32, %c0_i32_0 : i32, i32, i32
  }
}

</mosaic_0001>

<bundles_post_ra>
// kernel: tpu_custom_call.1
= control target key start
LH: loop header
LB: loop body
LE: loop exit
PB: predicated region body
PF: predicated region fallthrough
CT: control target
= control target key end

     0   :  { %13 = vsyncpa [#allocation3], 0  ;;  %s1462_s0 = inlined_call_operand.vmem [shape: bf16[2,8,256], index: 0, kind: input, shape index: {}]   ;;  %s1463_s1 = inlined_call_operand.vmem [shape: bf16[2,4,256], index: 1, kind: input, shape index: {}]   ;;  %s1464_s2 = inlined_call_operand.vmem [shape: bf16[64,4], index: 2, kind: input, shape index: {}]   ;;  %s1465_s3 = inlined_call_operand.vmem [shape: bf16[16,8], index: 3, kind: input, shape index: {}]   ;;  %s1466_s4 = inlined_call_operand.vmem [shape: bf16[16,8], index: 4, kind: input, shape index: {}]   ;;  %s1467_s5 = inlined_call_operand.vmem [shape: bf16[8,16], index: 5, kind: input, shape index: {}]   ;;  %s1468_s6 = inlined_call_operand.vmem [shape: bf16[8,16], index: 6, kind: input, shape index: {}]   ;;  %s1469_s7 = inlined_call_operand.vmem [shape: f32[112,1], index: 7, kind: input, shape index: {}]   ;;  %s1470_s8 = inlined_call_operand.hbm [shape: bf16[2,8,256], index: 8, kind: output, shape index: {}]  }
   0x1   :  { %15 = vsyncpa [#allocation3 + $0x1], 0  ;;  %s1248_s27 = smov 0   ;;  %s1250_s28 = smov 0  }
   0x2   :  { %s1252_s29 = smov 0   ;;  %s1254_s30 = smov 0  }
   0x3 LB: > { %s1269_s9 = sadd.s32 4294967295, %s1199_s30   ;;  %s1023_s10 = sadd.s32 4294967294, %s1199_s30   ;;  %s1199_s30 = sphi %s1254_s30, %s1476_s30   ;;  %s1195_s29 = sphi %s1252_s29, %s1475_s29   ;;  %s1191_s28 = sphi %s1250_s28, %s1474_s28   ;;  %s1187_s27 = sphi %s1248_s27, %s1473_s27  }
   0x4   : > { %s1273_s11 = sadd.s32 1, %s1199_s30   ;;  %s206_s12 = sadd.s32 1, %s1195_s29 }
   0x5   : > { %s203_s13 = ssub.s32 %s1199_s30, %s1273_s11  ;;  %p216_p0 = scmp.ne.s32.totalorder %s1195_s29, %s1191_s28 }
   0x6   : > { %p204_p1 = scmp.eq.s32.totalorder %s203_s13, 0  ;;  %p217_p2 = scmp.eq.s32.totalorder %s1269_s9, 1 }
   0x7   : > { %p222_p3 = scmp.ne.s32.totalorder %s1191_s28, %s1187_s27  ;;  %p223_p4 = scmp.eq.s32.totalorder %s1023_s10, 1 }
   0x8   : > { %s1284_s14 = scalar_select %p204_p1, %s1195_s29, %s206_s12  }
   0x9   : > { %p1286_p5 = por %p217_p2, %p216_p0  ;;  %p1290_p6 = por %p223_p4, %p222_p3 }
   0xa   : > { %p1026_p7 = scmp.ge.s32.totalorder %s1199_s30, 1  ;;  %p275_p8 = scmp.lt.s32.totalorder %s1199_s30, 3 }
   0xc   : > { %p276_p9 = pnand %p1026_p7, %p275_p8 }
   0xd   : > { %p314_p10 = scmp.lt.s32.totalorder (!%p276_p9), %s1269_s9, 1  ;;  %s311_s18 = sand.u32 (!%p276_p9), 1, %s1191_s28  }
   0xe   : > { %279 = sbr.rel (%p276_p9) target bundleno = 1223 (0x4c7), region = 52  ;;  %s1027_s19 = sshll.u32 (!%p276_p9), %s311_s18, 3 }
   0xf   : > { %s313_s20 = scalar_lea.vmem (!%p276_p9), [#allocation2], %s1027_s19  ;;  %s936_s10 = scalar_lea.sflag (!%p276_p9), [#allocation3], %s311_s18 }
  0x10   : > { %s949_s25 = sshll.u32 (!%p276_p9), %s313_s20, 4  ;;  %s1157_s19 = scalar_lea.hbm (!%p276_p9), %s1470_s8, 16  ;;  %s950_s25 = int_to_ptr.vmem [resolvable:$true] %s949_s25 }
  0x13   : > { %v329_v0 = vld [vmem:[%s1469_s7 + $0x10] sm:$0xff]  ;;  %v1201_v1 = vmov 0   ;;  %v335_v2 = vld [vmem:[%s1469_s7 + $0x40] sm:$0xff]  ;;  %s315_s21 = scalar_select %p314_p10, %s1269_s9, 1  ;;  %v330_v5 = vld [vmem:[%s1469_s7 + $0x18] sm:$0xff]  ;;  %vm529_vm0 = vcmask 1043456   ;;  %v489_v34 = vlaneseq }
  0x14   : > { %1134 = vset.pattern.permute.xlu0 %v1201_v1  ;;  %1135 = vset.pattern.permute.xlu1 %v1201_v1  ;;  %v336_v8 = vld [vmem:[%s1469_s7 + $0x48] sm:$0xff]  ;;  %v1090_v13 = vld [vmem:[%s1465_s3] sm:$0xff]  ;;  %vm426_vm1 = vcmask 1041408   ;;  %vm525_vm2 = vcmask 64512   ;;  %v333_v19 = vld [vmem:[%s1469_s7 + $0x30] sm:$0xff]  ;;  %vm413_vm3 = vcmask 31744  }
  0x15   : > { %361 = vperm.xlu0 %1134, %v329_v0   ;;  %507 = vperm.xlu1 %1135, %v335_v2   ;;  %s1085_s22 = sshll.u32 %s315_s21, 2  ;;  %s1084_s23 = sshll.u32 %s315_s21, 3  ;;  %v1086_v18 = vld [vmem:[%s1464_s2] sm:$0xff]  ;;  %v334_v20 = vld [vmem:[%s1469_s7 + $0x38] sm:$0xff]  ;;  %v332_v23 = vld [vmem:[%s1469_s7 + $0x28] sm:$0xff]  ;;  %v490_v37 = vand.u32 127, %v489_v34 }
  0x16   : > { %1136 = vset.pattern.permute.xlu2 %v1201_v1  ;;  %s323_s26 = scalar_lea.vmem %s1463_s1, %s1085_s22  ;;  %s318_s13 = scalar_lea.vmem %s1462_s0, %s1084_s23  ;;  %v327_v21 = vld [vmem:[%s1469_s7] sm:$0xff]  ;;  %v328_v24 = vld [vmem:[%s1469_s7 + $0x8] sm:$0xff]  ;;  %v338_v26 = vld [vmem:[%s1469_s7 + $0x58] sm:$0xff]  ;;  %v1202_v42 = vmov 0.0   ;;  %vm599_vm5 = vcmask 130048  }
  0x17   : > { %v326_v3 = vld [vmem:[%s323_s26] sm:$0xf]  ;;  %351 = vperm.xlu2 %1136, %v327_v21   ;;  %v1087_v25 = vld [vmem:[%s1464_s2 + $0x8] sm:$0xff]  ;;  %v1088_v28 = vld [vmem:[%s1464_s2 + $0x10] sm:$0xff]  ;;  %vm491_vm4 = vcmp.lt.s32.totalorder %v490_v37, 32  ;;  %s1092_s21 = sshll.u32 %s1269_s9, 3 }
  0x18   : > { %v1310_v4 = vld [vmem:[%s318_s13] sm:$0xff]  ;;  %410 = vst [vmem:[#allocation1] ss:$4 sm:$0xff] %v326_v3  ;;  %v340_v27 = vld [vmem:[%s1469_s7 + $0x68] sm:$0xff]  ;;  %v1089_v29 = vld [vmem:[%s1464_s2 + $0x18] sm:$0xff]  ;;  %v1056_v43 = vsel %vm491_vm4, 1.0, %v1202_v42  ;;  %s947_s24 = scalar_lea.hbm %s1470_s8, %s1092_s21 }
  0x19   : > { %v521_v6 = vunpack.c.l.b16 %v1310_v4  ;;  %v522_v7 = vunpack.c.h.b16 %v1310_v4  ;;  %v331_v22 = vld [vmem:[%s1469_s7 + $0x20] sm:$0xff]  ;;  %v1371_v48 = vperm.slane %v1056_v43, 0  ;;  %s951_s26 = sshll.u32 %s947_s24, 4  ;;  %s952_s26 = int_to_ptr.hbm [resolvable:$true] %s951_s26 }
  0x1a   : > { %s1151_s12 = sshra.s32 %s952_s26, 4  ;;  %s1152_s12 = int_to_ptr.hbm [resolvable:$true] %s1151_s12 }
  0x1b   : > { %v523_v9 = vpack.c.b16 %v521_v6, %v521_v6  ;;  %v524_v10 = vpack.c.b16 %v522_v7, %v522_v7  ;;  %v339_v7 = vld [vmem:[%s1469_s7 + $0x60] sm:$0xff]  ;;  %s1153_s9 = scalar_lea.hbm %s1152_s12, 8  ;;  %p1158_p0 = scmp.lt.s32.totalorder %s1152_s12, %s1470_s8 }
  0x1c   : > { %p1154_p11 = scmp.ne.s32.totalorder %s1152_s12, %s1153_s9  ;;  %p1159_p1 = scmp.lt.s32.totalorder %s1157_s19, %s1153_s9 }
  0x1d   : > { %366 = vperm.xlu0 %1134, %v330_v5   ;;  %512 = vperm.xlu1 %1135, %v336_v8   ;;  %v531_v11 = vsel %vm529_vm0, %v523_v9, 0  ;;  %v534_v12 = vsel %vm529_vm0, %v524_v10, 0 }
  0x1e   : > { %543 = vmatpush.bf16.msra.mxu2 %v531_v11  ;;  %557 = vmatpush.bf16.msra.mxu3 %v534_v12  ;;  %p1155_p12 = pnand %p1154_p11, %p1286_p5  ;;  %p1160_p2 = por %p1159_p1, %p1158_p0 }
  0x1f   : > { %v411_v14 = vld.sshfl [vmem:[#allocation1] sm:$0xff pattern:$0x73625140]  ;;  %v412_v15 = vld.sshfl [vmem:[#allocation1 + $0x8] sm:$0xff pattern:$0x73625140]  ;;  %356 = vperm.xlu2 %1136, %v328_v24  }
  0x20   : > { %v427_v16 = vsel %vm426_vm1, %v411_v14, 0  ;;  %v429_v17 = vsel %vm426_vm1, %v412_v15, 0  ;;  %p1156_p13 = pneg %p1155_p12 }
  0x21   : > { %1061 = vmatmul.msk.bf16.vlgmr.msra.gmra.mxu2 %vm525_vm2, %v1090_v13  ;;  %1062 = vmatmul.msk.bf16.vlgmr.msra.gmra.mxu3 %vm525_vm2, %v1090_v13  ;;  %v337_v13 = vld [vmem:[%s1469_s7 + $0x50] sm:$0xff] }
  0x22   : > { %438 = vmatpush.bf16.msra.mxu0 %v427_v16  ;;  %467 = vmatpush.bf16.msra.mxu1 %v429_v17  ;;  %p1161_p3 = pnand %p1160_p2, %p1156_p13 }
  0x25   : > { %381 = vperm.xlu0 %1134, %v333_v19   ;;  %386 = vperm.xlu1 %1135, %v334_v20  }
  0x26   : > { %1048 = vmatmul.msk.bf16.vlgmr.msra.gmra.mxu0 %vm413_vm3, %v1086_v18  ;;  %1052 = vmatmul.msk.bf16.vlgmr.msra.gmra.mxu1 %vm413_vm3, %v1086_v18 }
  0x27   : > { %636 = vperm.xlu2 %1136, %v339_v7   ;;  %v669_v7 = vunpack.c.h.bf16 %v1310_v4 }
  0x2d   : > { %371 = vperm.xlu0 %1134, %v331_v22   ;;  %376 = vperm.xlu1 %1135, %v332_v23  }
  0x2f   : > { %678 = vperm.xlu2 %1136, %v337_v13  }
  0x35   : > { %683 = vperm.xlu0 %1134, %v338_v26   ;;  %828 = vperm.xlu1 %1135, %v340_v27  }
  0x36   : > { %1049 = vmatmul.msk.bf16.gmra.mxu0 %vm413_vm3, %v1087_v25  ;;  %1053 = vmatmul.msk.bf16.gmra.mxu1 %vm413_vm3, %v1087_v25 }
  0x46   : > { %1050 = vmatmul.msk.bf16.gmra.mxu0 %vm413_vm3, %v1088_v28  ;;  %1054 = vmatmul.msk.bf16.gmra.mxu1 %vm413_vm3, %v1088_v28 }
  0x56   : > { %1051 = vmatmul.msk.bf16.gmra.mxu0 %vm413_vm3, %v1089_v29  ;;  %1055 = vmatmul.msk.bf16.gmra.mxu1 %vm413_vm3, %v1089_v29 }
  0x71   : > { %v352_v36 = vpop.permute.xlu2 %351 }
  0x79   : > { %v357_v46 = vpop.permute.xlu2 %356 }
  0x87   : > { %v362_v35 = vpop.permute.xlu0 %361  ;;  %v508_v44 = vpop.permute.xlu1 %507 }
  0x8f   : > { %v367_v45 = vpop.permute.xlu0 %366  ;;  %v513_v5 = vpop.permute.xlu1 %512 }
  0x97   : > { %v387_v29 = vpop.permute.xlu1 %386 }
  0xa3   : > { %v440_v30 = vpop.f32.mrf.mxu0  ;;  %v469_v31 = vpop.f32.mrf.mxu1 }
  0xa4   : > { %v545_v40 = vpop.f32.mrf.mxu2  ;;  %v559_v41 = vpop.f32.mrf.mxu3  ;;  %v441_v60 = vadd.f32 %v440_v30, %v352_v36  ;;  %v470_v61 = vadd.f32 %v469_v31, %v352_v36 }
  0xa5   : > { %v546_v6 = vadd.f32 %v545_v40, %v508_v44  ;;  %v560_v8 = vadd.f32 %v559_v41, %v508_v44 }
  0xab   : > { %v442_v32 = vpop.f32.mrf.mxu0  ;;  %v471_v33 = vpop.f32.mrf.mxu1 }
  0xac   : > { %v443_v54 = vadd.f32 %v442_v32, %v357_v46  ;;  %v472_v55 = vadd.f32 %v471_v33, %v357_v46  ;;  %v547_v62 = vpop.f32.mrf.mxu2  ;;  %v561_v63 = vpop.f32.mrf.mxu3 }
  0xad   : > { %v548_v9 = vadd.f32 %v547_v62, %v513_v5  ;;  %v562_v10 = vadd.f32 %v561_v63, %v513_v5  ;;  %v382_v32 = vpop.permute.xlu0 %381  ;;  %v637_v5 = vpop.permute.xlu2 %636 }
  0xae   : > { %v597_v2 = vpack.c.bf16 %v443_v54, %v441_v60  ;;  %v598_v3 = vpack.c.bf16 %v472_v55, %v470_v61  ;;  %v377_v54 = vpop.permute.xlu1 %376 }
  0xaf   : > { %v564_v11 = vpack.c.bf16 %v548_v9, %v546_v6  ;;  %v565_v12 = vpack.c.bf16 %v562_v10, %v560_v8  ;;  %v668_v6 = vunpack.c.l.bf16 %v1310_v4  ;;  %v1091_v4 = vld [vmem:[%s1466_s4] sm:$0xff] }
  0xb3   : > { %v445_v38 = vpop.f32.mrf.mxu0  ;;  %v474_v39 = vpop.f32.mrf.mxu1 }
  0xb4   : > { %v446_v47 = vadd.f32 %v445_v38, %v362_v35  ;;  %v475_v49 = vadd.f32 %v474_v39, %v362_v35 }
  0xb6   : > { %v495_v56 = vmul.f32 %v1371_v48, %v446_v47  ;;  %v496_v57 = vmul.f32 %v1371_v48, %v475_v49 }
  0xbb   : > { %v447_v50 = vpop.f32.mrf.mxu0  ;;  %v476_v51 = vpop.f32.mrf.mxu1 }
  0xbc   : > { %v448_v52 = vadd.f32 %v447_v50, %v367_v45  ;;  %v477_v53 = vadd.f32 %v476_v51, %v367_v45 }
  0xbe   : > { %v497_v58 = vmul.f32 %v1371_v48, %v448_v52  ;;  %v498_v59 = vmul.f32 %v1371_v48, %v477_v53 }
  0xc0   : > { %v566_v0 = vpack.c.bf16 %v497_v58, %v495_v56  ;;  %v567_v1 = vpack.c.bf16 %v498_v59, %v496_v57  ;;  %v372_v57 = vpop.permute.xlu0 %371 }
  0xc2   : > { %575 = vmatpush.bf16.xpose.msrb.mxu2 %v566_v0  ;;  %589 = vmatpush.bf16.xpose.msrb.mxu3 %v567_v1 }
  0xc3   : > { %v450_v21 = vpop.f32.mrf.mxu0  ;;  %v479_v22 = vpop.f32.mrf.mxu1 }
  0xc4   : > { %v451_v58 = vadd.f32 %v450_v21, %v372_v57  ;;  %v480_v59 = vadd.f32 %v479_v22, %v372_v57  ;;  %v679_v22 = vpop.permute.xlu2 %678 }
  0xc6   : > { %v730_v61 = vpack.c.bf16 %v480_v59, %v451_v58  ;;  %v829_v58 = vpop.permute.xlu1 %828 }
  0xc8   : > { %v737_v63 = vunpack.c.l.b16 %v730_v61 }
  0xc9   : > { %576 = vmatmul.bf16.vlgmr.msrb.gmra.mxu2 %v564_v11  ;;  %590 = vmatmul.bf16.vlgmr.msrb.gmra.mxu3 %v565_v12 }
  0xca   : > { %610 = vmatpush.bf16.msra.mxu2 %v597_v2  ;;  %624 = vmatpush.bf16.msra.mxu3 %v598_v3  ;;  %v850_v2 = vunpack.c.h.b16 %v730_v61 }
  0xcb   : > { %v452_v23 = vpop.f32.mrf.mxu0  ;;  %v481_v24 = vpop.f32.mrf.mxu1 }
  0xcc   : > { %v453_v55 = vadd.f32 %v452_v23, %v377_v54  ;;  %v482_v56 = vadd.f32 %v481_v24, %v377_v54 }
  0xce   : > { %v731_v60 = vpack.c.bf16 %v482_v56, %v453_v55 }
  0xd0   : > { %v738_v62 = vunpack.c.l.b16 %v731_v60  ;;  %v851_v1 = vunpack.c.h.b16 %v731_v60 }
  0xd2   : > { %v739_v0 = vpack.c.b16 %v738_v62, %v737_v63  ;;  %v852_v3 = vpack.c.b16 %v851_v1, %v850_v2 }
  0xd3   : > { %v455_v25 = vpop.f32.mrf.mxu0  ;;  %v484_v26 = vpop.f32.mrf.mxu1 }
  0xd4   : > { %v456_v33 = vadd.f32 %v455_v25, %v382_v32  ;;  %v485_v34 = vadd.f32 %v484_v26, %v382_v32 }
  0xd6   : > { %v499_v37 = vmul.f32 %v1371_v48, %v456_v33  ;;  %v500_v38 = vmul.f32 %v1371_v48, %v485_v34 }
  0xd8   : > { %v732_v42 = vpack.c.bf16 %v500_v38, %v499_v37 }
  0xda   : > { %v743_v45 = vunpack.c.l.b16 %v732_v42  ;;  %v762_v46 = vunpack.c.h.b16 %v732_v42 }
  0xdb   : > { %v457_v27 = vpop.f32.mrf.mxu0  ;;  %v486_v28 = vpop.f32.mrf.mxu1 }
  0xdc   : > { %v458_v30 = vadd.f32 %v457_v27, %v387_v29  ;;  %v487_v31 = vadd.f32 %v486_v28, %v387_v29  ;;  %v684_v27 = vpop.permute.xlu0 %683 }
  0xde   : > { %v501_v35 = vmul.f32 %v1371_v48, %v458_v30  ;;  %v502_v36 = vmul.f32 %v1371_v48, %v487_v31  ;;  %v631_v48 = vld [vmem:[%s1467_s5] sm:$0xf] }
  0xe0   : > { %v733_v41 = vpack.c.bf16 %v502_v36, %v501_v35 }
  0xe2   : > { %v744_v43 = vunpack.c.l.b16 %v733_v41  ;;  %v763_v44 = vunpack.c.h.b16 %v733_v41 }
  0xe4   : > { %v745_v52 = vpack.c.b16 %v744_v43, %v743_v45  ;;  %v1389_v53 = vpack.c.b16 %v763_v44, %v762_v46 }
 0x14c   : > { %v577_v14 = vpop.f32.mrf.mxu2  ;;  %v591_v15 = vpop.f32.mrf.mxu3 }
 0x14d   : > { %v592_v18 = vadd.f32 %v591_v15, %v577_v14 }
 0x154   : > { %v579_v16 = vpop.f32.mrf.mxu2  ;;  %v593_v17 = vpop.f32.mrf.mxu3 }
 0x155   : > { %v594_v19 = vadd.f32 %v593_v17, %v579_v16 }
 0x157   : > { %v596_v20 = vpack.c.bf16 %v594_v19, %v592_v18 }
 0x159   : > { %1063 = vmatmul.msk.bf16.vlgmr.msra.gmra.mxu2 %vm599_vm5, %v596_v20  ;;  %1064 = vmatmul.msk.bf16.vlgmr.msra.gmra.mxu3 %vm599_vm5, %v596_v20 }
 0x1dc   : > { %v612_v39 = vpop.f32.mrf.mxu2  ;;  %v626_v40 = vpop.f32.mrf.mxu3 }
 0x1e4   : > { %v614_v47 = vpop.f32.mrf.mxu2  ;;  %v628_v49 = vpop.f32.mrf.mxu3 }
 0x1e5   : > { %v632_v50 = vpack.c.bf16 %v614_v47, %v612_v39  ;;  %v633_v51 = vpack.c.bf16 %v628_v49, %v626_v40 }
 0x1e7   : > { %649 = vmatpush.bf16.msrb.mxu2 %v632_v50  ;;  %662 = vmatpush.bf16.msrb.mxu3 %v633_v51 }
 0x1ea   : > { %1065 = vmatmul.msk.bf16.vlgmr.msrb.gmra.mxu2 %vm599_vm5, %v631_v48  ;;  %1066 = vmatmul.msk.bf16.vlgmr.msrb.gmra.mxu3 %vm599_vm5, %v631_v48 }
 0x1eb   : > { %754 = vmatpush.bf16.xpose.msra.mxu2 %v745_v52  ;;  %773 = vmatpush.bf16.xpose.msra.mxu3 %v1389_v53 }
 0x1f3   : > { %861 = vmatpush.bf16.xpose.msrb.mxu3 %v745_v52  ;;  %v734_v52 = vld [vmem:[%s1468_s6] sm:$0xf] }
 0x1fa   : > { %755 = vmatmul.bf16.vlgmr.msra.gmra.mxu2 %v739_v0  ;;  %774 = vmatmul.bf16.vlgmr.msra.gmra.mxu3 %v739_v0 }
 0x20a   : > { %862 = vmatmul.bf16.vlgmr.msrb.gmra.mxu3 %v852_v3 }
 0x26d   : > { %v651_v8 = vpop.f32.mrf.mxu2  ;;  %v664_v9 = vpop.f32.mrf.mxu3 }
 0x26e   : > { %v652_v10 = vadd.f32 %v651_v8, %v637_v5  ;;  %v665_v11 = vadd.f32 %v664_v9, %v637_v5 }
 0x270   : > { %v1399_v12 = vadd.f32 %v668_v6, %v652_v10  ;;  %v1401_v13 = vadd.f32 %v669_v7, %v665_v11 }
 0x272   : > { %v674_v14 = vpack.c.bf16 %v1399_v12, %v1399_v12  ;;  %v675_v15 = vpack.c.bf16 %v1401_v13, %v1401_v13 }
 0x274   : > { %v695_v16 = vsel %vm529_vm0, %v674_v14, 0  ;;  %v698_v17 = vsel %vm529_vm0, %v675_v15, 0 }
 0x275   : > { %v653_v18 = vpop.f32.mrf.mxu2  ;;  %v666_v19 = vpop.f32.mrf.mxu3  ;;  %707 = vmatpush.bf16.msrb.mxu0 %v695_v16  ;;  %721 = vmatpush.bf16.msrb.mxu1 %v698_v17 }
 0x278   : > { %1071 = vmatmul.msk.bf16.vlgmr.msrb.gmra.mxu0 %vm525_vm2, %v1091_v4  ;;  %1072 = vmatmul.msk.bf16.vlgmr.msrb.gmra.mxu1 %vm525_vm2, %v1091_v4 }
 0x27d   : > { %v756_v23 = vpop.f32.mrf.mxu2  ;;  %v775_v24 = vpop.f32.mrf.mxu3 }
 0x285   : > { %v758_v38 = vpop.f32.mrf.mxu2  ;;  %v777_v39 = vpop.f32.mrf.mxu3 }
 0x286   : > { %v761_v42 = vpack.c.bf16 %v758_v38, %v756_v23  ;;  %v780_v43 = vpack.c.bf16 %v777_v39, %v775_v24 }
 0x28d   : > { %v863_v48 = vpop.f32.mrf.mxu3 }
 0x295   : > { %v865_v56 = vpop.f32.mrf.mxu3 }
 0x296   : > { %v868_v57 = vpack.c.bf16 %v865_v56, %v863_v48 }
 0x2f5   : > { %v709_v20 = vpop.f32.mrf.mxu0  ;;  %v723_v21 = vpop.f32.mrf.mxu1 }
 0x2f6   : > { %v710_v25 = vadd.f32 %v709_v20, %v679_v22  ;;  %v724_v26 = vadd.f32 %v723_v21, %v679_v22 }
 0x2f8   : > { %v728_v30 = vpack.c.bf16 %v724_v26, %v710_v25 }
 0x2fa   : > { %v783_v34 = vunpack.c.h.b16 %v728_v30  ;;  %v804_v35 = vunpack.c.l.b16 %v728_v30 }
 0x2fd   : > { %v711_v28 = vpop.f32.mrf.mxu0  ;;  %v725_v29 = vpop.f32.mrf.mxu1 }
 0x2fe   : > { %v712_v31 = vadd.f32 %v711_v28, %v684_v27  ;;  %v726_v32 = vadd.f32 %v725_v29, %v684_v27 }
 0x300   : > { %v729_v33 = vpack.c.bf16 %v726_v32, %v712_v31 }
 0x302   : > { %v784_v36 = vunpack.c.h.b16 %v729_v33  ;;  %v805_v37 = vunpack.c.l.b16 %v729_v33 }
 0x304   : > { %v785_v40 = vpack.c.b16 %v784_v36, %v783_v34  ;;  %v806_v41 = vpack.c.b16 %v805_v37, %v804_v35 }
 0x306   : > { %797 = vmatpush.bf16.msra.mxu0 %v785_v40  ;;  %818 = vmatpush.bf16.msra.mxu1 %v806_v41 }
 0x309   : > { %1073 = vmatmul.msk.bf16.vlgmr.msra.gmra.mxu0 %vm599_vm5, %v780_v43  ;;  %1074 = vmatmul.msk.bf16.vlgmr.msra.gmra.mxu1 %vm599_vm5, %v761_v42 }
 0x30a   : > { %876 = vmatpush.bf16.xpose.msrb.mxu0 %v1389_v53  ;;  %894 = vmatpush.bf16.msrb.mxu1 %v785_v40 }
 0x319   : > { %877 = vmatmul.bf16.vlgmr.msrb.gmra.mxu0 %v852_v3 }
 0x386   : > { %v799_v44 = vpop.f32.mrf.mxu0  ;;  %v820_v45 = vpop.f32.mrf.mxu1 }
 0x387   : > { %v821_v49 = vadd.f32 %v820_v45, %v799_v44 }
 0x38e   : > { %v801_v46 = vpop.f32.mrf.mxu0  ;;  %v822_v47 = vpop.f32.mrf.mxu1 }
 0x38f   : > { %v823_v50 = vadd.f32 %v822_v47, %v801_v46 }
 0x391   : > { %v825_v51 = vpack.c.bf16 %v823_v50, %v821_v49 }
 0x393   : > { %841 = vmatpush.bf16.msrb.mxu2 %v825_v51 }
 0x396   : > { %1075 = vmatmul.msk.bf16.vlgmr.msrb.gmra.mxu2 %vm599_vm5, %v734_v52  ;;  %v878_v53 = vpop.f32.mrf.mxu0 }
 0x397   : > { %911 = vmatpush.bf16.msra.mxu2 %v806_v41 }
 0x39e   : > { %v880_v54 = vpop.f32.mrf.mxu0 }
 0x39f   : > { %v883_v55 = vpack.c.bf16 %v880_v54, %v878_v53 }
 0x3a1   : > { %1076 = vmatmul.msk.bf16.vlgmr.msrb.gmra.mxu1 %vm599_vm5, %v883_v55 }
 0x3a6   : > { %1077 = vmatmul.msk.bf16.vlgmr.msra.gmra.mxu2 %vm599_vm5, %v868_v57 }
 0x419   : > { %v843_v59 = vpop.f32.mrf.mxu2 }
 0x41a   : > { %v844_v60 = vadd.f32 %v843_v59, %v829_v58 }
 0x41c   : > { %v847_v61 = vadd.f32 %v844_v60, %v1399_v12 }
 0x41e   : > { %v848_v62 = vpack.c.bf16 %v847_v61, %v847_v61  ;;  %v896_v0 = vpop.f32.mrf.mxu1 }
 0x420   : > { %849 = vst [vmem:[%s313_s20] sm:$0xf] %v848_v62 }
 0x421   : > { %v845_v63 = vpop.f32.mrf.mxu2 }
 0x426   : > { %v898_v2 = vpop.f32.mrf.mxu1 }
 0x429   : > { %v913_v1 = vpop.f32.mrf.mxu2 }
 0x42a   : > { %v914_v5 = vadd.f32 %v913_v1, %v896_v0 }
 0x431   : > { %v915_v3 = vpop.f32.mrf.mxu2 }
 0x432   : > { %v916_v6 = vadd.f32 %v915_v3, %v898_v2 }
 0x434   : > { %v918_v7 = vpack.c.bf16 %v916_v6, %v914_v5 }
 0x436   : > { %926 = vmatpush.bf16.msra.mxu3 %v918_v7 }
 0x439   : > { %1078 = vmatmul.msk.bf16.vlgmr.msra.gmra.mxu3 %vm599_vm5, %v734_v52 }
 0x4bc   : > { %v928_v8 = vpop.f32.mrf.mxu3 }
 0x4bd   : > { %v929_v9 = vadd.f32 %v928_v8, %v829_v58 }
 0x4bf   : > { %v932_v10 = vadd.f32 %v929_v9, %v1401_v13 }
 0x4c1   : > { %v933_v11 = vpack.c.bf16 %v932_v10, %v932_v10 }
 0x4c3   : > { %934 = vst [vmem:[%s313_s20 + $0x4] sm:$0xf] %v933_v11 }
 0x4c4   : > { %v930_v12 = vpop.f32.mrf.mxu3 }
 0x4c5   : > { %1164 = shalt.err (!%p1161_p3)
}
 0x4c6   : > { %1093 = dma.vmem_to_hbm [thread:$0]  (%p1286_p5), %s950_s25, 128, %s952_s26, %s936_s10  }
 0x4c7 PF: > { %p1099_p4 = scmp.ge.s32.totalorder %s1199_s30, 2  ;;  %s963_s18 = sand.u32 1, %s1187_s27  }
 0x4c8   : > { %s964_s20 = scalar_lea.sflag [#allocation3], %s963_s18 }
 0x4c9   : > { %p1096_p7 = pnand %p1099_p4, %p1290_p6 }
 0x4cb   : > { %p1097_p8 = pneg %p1096_p7 }
 0x4cd   : > { %1182 = dma.done.wait (%p1097_p8), %s964_s20, 128  }
 0x4ce   : > { %1184 = vsyncadd (%p1097_p8), %s964_s20, 4294967168  ;;  %p18_p9 = scmp.ge.s32.totalorder %s1273_s11, 4   ;;  %s1473_s27 = smov %s1191_s28 }
 0x4cf   : > { %s1474_s28 = smov %s1195_s29  ;;  %s1475_s29 = smov %s1284_s14 }
 0x4d0   : > { %s1476_s30 = smov %s1273_s11  ;;  %20 = sbr.rel (!%p18_p9) target bundleno = 3 (0x3), region = 90 }
 0x4d5   :  { %970 = vsyncpa [#allocation3], 1 }
 0x4d6   :  { %972 = vsyncpa [#allocation3 + $0x1], 1 }

// kernel: tpu_custom_call.1
= control target key start
LH: loop header
LB: loop body
LE: loop exit
PB: predicated region body
PF: predicated region fallthrough
CT: control target
= control target key end

     0   :  { %13 = vsyncpa [#allocation3], 0  ;;  %s1462_s0 = inlined_call_operand.vmem [shape: bf16[2,8,256], index: 0, kind: input, shape index: {}]   ;;  %s1463_s1 = inlined_call_operand.vmem [shape: bf16[2,4,256], index: 1, kind: input, shape index: {}]   ;;  %s1464_s2 = inlined_call_operand.vmem [shape: bf16[64,4], index: 2, kind: input, shape index: {}]   ;;  %s1465_s3 = inlined_call_operand.vmem [shape: bf16[16,8], index: 3, kind: input, shape index: {}]   ;;  %s1466_s4 = inlined_call_operand.vmem [shape: bf16[16,8], index: 4, kind: input, shape index: {}]   ;;  %s1467_s5 = inlined_call_operand.vmem [shape: bf16[8,16], index: 5, kind: input, shape index: {}]   ;;  %s1468_s6 = inlined_call_operand.vmem [shape: bf16[8,16], index: 6, kind: input, shape index: {}]   ;;  %s1469_s7 = inlined_call_operand.vmem [shape: f32[112,1], index: 7, kind: input, shape index: {}]   ;;  %s1470_s8 = inlined_call_operand.hbm [shape: bf16[2,8,256], index: 8, kind: output, shape index: {}]  }
   0x1   :  { %15 = vsyncpa [#allocation3 + $0x1], 0  ;;  %s1248_s27 = smov 0   ;;  %s1250_s28 = smov 0  }
   0x2   :  { %s1252_s29 = smov 0   ;;  %s1254_s30 = smov 0  }
   0x3 LB: > { %s1269_s9 = sadd.s32 4294967295, %s1199_s30   ;;  %s1023_s10 = sadd.s32 4294967294, %s1199_s30   ;;  %s1199_s30 = sphi %s1254_s30, %s1476_s30   ;;  %s1195_s29 = sphi %s1252_s29, %s1475_s29   ;;  %s1191_s28 = sphi %s1250_s28, %s1474_s28   ;;  %s1187_s27 = sphi %s1248_s27, %s1473_s27  }
   0x4   : > { %s1273_s11 = sadd.s32 1, %s1199_s30   ;;  %s206_s12 = sadd.s32 1, %s1195_s29 }
   0x5   : > { %s203_s13 = ssub.s32 %s1199_s30, %s1273_s11  ;;  %p216_p0 = scmp.ne.s32.totalorder %s1195_s29, %s1191_s28 }
   0x6   : > { %p204_p1 = scmp.eq.s32.totalorder %s203_s13, 0  ;;  %p217_p2 = scmp.eq.s32.totalorder %s1269_s9, 1 }
   0x7   : > { %p222_p3 = scmp.ne.s32.totalorder %s1191_s28, %s1187_s27  ;;  %p223_p4 = scmp.eq.s32.totalorder %s1023_s10, 1 }
   0x8   : > { %s1284_s14 = scalar_select %p204_p1, %s1195_s29, %s206_s12  }
   0x9   : > { %p1286_p5 = por %p217_p2, %p216_p0  ;;  %p1290_p6 = por %p223_p4, %p222_p3 }
   0xa   : > { %p1026_p7 = scmp.ge.s32.totalorder %s1199_s30, 1  ;;  %p275_p8 = scmp.lt.s32.totalorder %s1199_s30, 3 }
   0xc   : > { %p276_p9 = pnand %p1026_p7, %p275_p8 }
   0xd   : > { %p314_p10 = scmp.lt.s32.totalorder (!%p276_p9), %s1269_s9, 1  ;;  %s311_s18 = sand.u32 (!%p276_p9), 1, %s1191_s28  }
   0xe   : > { %279 = sbr.rel (%p276_p9) target bundleno = 1223 (0x4c7), region = 52  ;;  %s1027_s19 = sshll.u32 (!%p276_p9), %s311_s18, 3 }
   0xf   : > { %s313_s20 = scalar_lea.vmem (!%p276_p9), [#allocation2], %s1027_s19  ;;  %s936_s10 = scalar_lea.sflag (!%p276_p9), [#allocation3], %s311_s18 }
  0x10   : > { %s949_s25 = sshll.u32 (!%p276_p9), %s313_s20, 4  ;;  %s1157_s19 = scalar_lea.hbm (!%p276_p9), %s1470_s8, 16  ;;  %s950_s25 = int_to_ptr.vmem [resolvable:$true] %s949_s25 }
  0x13   : > { %v329_v0 = vld [vmem:[%s1469_s7 + $0x10] sm:$0xff]  ;;  %v1201_v1 = vmov 0   ;;  %v335_v2 = vld [vmem:[%s1469_s7 + $0x40] sm:$0xff]  ;;  %s315_s21 = scalar_select %p314_p10, %s1269_s9, 1  ;;  %v330_v5 = vld [vmem:[%s1469_s7 + $0x18] sm:$0xff]  ;;  %vm529_vm0 = vcmask 1043456   ;;  %v489_v34 = vlaneseq }
  0x14   : > { %1134 = vset.pattern.permute.xlu0 %v1201_v1  ;;  %1135 = vset.pattern.permute.xlu1 %v1201_v1  ;;  %v336_v8 = vld [vmem:[%s1469_s7 + $0x48] sm:$0xff]  ;;  %v1090_v13 = vld [vmem:[%s1465_s3] sm:$0xff]  ;;  %vm426_vm1 = vcmask 1041408   ;;  %vm525_vm2 = vcmask 64512   ;;  %v333_v19 = vld [vmem:[%s1469_s7 + $0x30] sm:$0xff]  ;;  %vm413_vm3 = vcmask 31744  }
  0x15   : > { %361 = vperm.xlu0 %1134, %v329_v0   ;;  %507 = vperm.xlu1 %1135, %v335_v2   ;;  %s1085_s22 = sshll.u32 %s315_s21, 2  ;;  %s1084_s23 = sshll.u32 %s315_s21, 3  ;;  %v1086_v18 = vld [vmem:[%s1464_s2] sm:$0xff]  ;;  %v334_v20 = vld [vmem:[%s1469_s7 + $0x38] sm:$0xff]  ;;  %v332_v23 = vld [vmem:[%s1469_s7 + $0x28] sm:$0xff]  ;;  %v490_v37 = vand.u32 127, %v489_v34 }
  0x16   : > { %1136 = vset.pattern.permute.xlu2 %v1201_v1  ;;  %s323_s26 = scalar_lea.vmem %s1463_s1, %s1085_s22  ;;  %s318_s13 = scalar_lea.vmem %s1462_s0, %s1084_s23  ;;  %v327_v21 = vld [vmem:[%s1469_s7] sm:$0xff]  ;;  %v328_v24 = vld [vmem:[%s1469_s7 + $0x8] sm:$0xff]  ;;  %v338_v26 = vld [vmem:[%s1469_s7 + $0x58] sm:$0xff]  ;;  %v1202_v42 = vmov 0.0   ;;  %vm599_vm5 = vcmask 130048  }
  0x17   : > { %v326_v3 = vld [vmem:[%s323_s26] sm:$0xf]  ;;  %351 = vperm.xlu2 %1136, %v327_v21   ;;  %v1087_v25 = vld [vmem:[%s1464_s2 + $0x8] sm:$0xff]  ;;  %v1088_v28 = vld [vmem:[%s1464_s2 + $0x10] sm:$0xff]  ;;  %vm491_vm4 = vcmp.lt.s32.totalorder %v490_v37, 32  ;;  %s1092_s21 = sshll.u32 %s1269_s9, 3 }
  0x18   : > { %v1310_v4 = vld [vmem:[%s318_s13] sm:$0xff]  ;;  %410 = vst [vmem:[#allocation1] ss:$4 sm:$0xff] %v326_v3  ;;  %v340_v27 = vld [vmem:[%s1469_s7 + $0x68] sm:$0xff]  ;;  %v1089_v29 = vld [vmem:[%s1464_s2 + $0x18] sm:$0xff]  ;;  %v1056_v43 = vsel %vm491_vm4, 1.0, %v1202_v42  ;;  %s947_s24 = scalar_lea.hbm %s1470_s8, %s1092_s21 }
  0x19   : > { %v521_v6 = vunpack.c.l.b16 %v1310_v4  ;;  %v522_v7 = vunpack.c.h.b16 %v1310_v4  ;;  %v331_v22 = vld [vmem:[%s1469_s7 + $0x20] sm:$0xff]  ;;  %v1371_v48 = vperm.slane %v1056_v43, 0  ;;  %s951_s26 = sshll.u32 %s947_s24, 4  ;;  %s952_s26 = int_to_ptr.hbm [resolvable:$true] %s951_s26 }
  0x1a   : > { %s1151_s12 = sshra.s32 %s952_s26, 4  ;;  %s1152_s12 = int_to_ptr.hbm [resolvable:$true] %s1151_s12 }
  0x1b   : > { %v523_v9 = vpack.c.b16 %v521_v6, %v521_v6  ;;  %v524_v10 = vpack.c.b16 %v522_v7, %v522_v7  ;;  %v339_v7 = vld [vmem:[%s1469_s7 + $0x60] sm:$0xff]  ;;  %s1153_s9 = scalar_lea.hbm %s1152_s12, 8  ;;  %p1158_p0 = scmp.lt.s32.totalorder %s1152_s12, %s1470_s8 }
  0x1c   : > { %p1154_p11 = scmp.ne.s32.totalorder %s1152_s12, %s1153_s9  ;;  %p1159_p1 = scmp.lt.s32.totalorder %s1157_s19, %s1153_s9 }
  0x1d   : > { %366 = vperm.xlu0 %1134, %v330_v5   ;;  %512 = vperm.xlu1 %1135, %v336_v8   ;;  %v531_v11 = vsel %vm529_vm0, %v523_v9, 0  ;;  %v534_v12 = vsel %vm529_vm0, %v524_v10, 0 }
  0x1e   : > { %543 = vmatpush.bf16.msra.mxu2 %v531_v11  ;;  %557 = vmatpush.bf16.msra.mxu3 %v534_v12  ;;  %p1155_p12 = pnand %p1154_p11, %p1286_p5  ;;  %p1160_p2 = por %p1159_p1, %p1158_p0 }
  0x1f   : > { %v411_v14 = vld.sshfl [vmem:[#allocation1] sm:$0xff pattern:$0x73625140]  ;;  %v412_v15 = vld.sshfl [vmem:[#allocation1 + $0x8] sm:$0xff pattern:$0x73625140]  ;;  %356 = vperm.xlu2 %1136, %v328_v24  }
  0x20   : > { %v427_v16 = vsel %vm426_vm1, %v411_v14, 0  ;;  %v429_v17 = vsel %vm426_vm1, %v412_v15, 0  ;;  %p1156_p13 = pneg %p1155_p12 }
  0x21   : > { %1061 = vmatmul.msk.bf16.vlgmr.msra.gmra.mxu2 %vm525_vm2, %v1090_v13  ;;  %1062 = vmatmul.msk.bf16.vlgmr.msra.gmra.mxu3 %vm525_vm2, %v1090_v13  ;;  %v337_v13 = vld [vmem:[%s1469_s7 + $0x50] sm:$0xff] }
  0x22   : > { %438 = vmatpush.bf16.msra.mxu0 %v427_v16  ;;  %467 = vmatpush.bf16.msra.mxu1 %v429_v17  ;;  %p1161_p3 = pnand %p1160_p2, %p1156_p13 }
  0x25   : > { %381 = vperm.xlu0 %1134, %v333_v19   ;;  %386 = vperm.xlu1 %1135, %v334_v20  }
  0x26   : > { %1048 = vmatmul.msk.bf16.vlgmr.msra.gmra.mxu0 %vm413_vm3, %v1086_v18  ;;  %1052 = vmatmul.msk.bf16.vlgmr.msra.gmra.mxu1 %vm413_vm3, %v1086_v18 }
  0x27   : > { %636 = vperm.xlu2 %1136, %v339_v7   ;;  %v669_v7 = vunpack.c.h.bf16 %v1310_v4 }
  0x2d   : > { %371 = vperm.xlu0 %1134, %v331_v22   ;;  %376 = vperm.xlu1 %1135, %v332_v23  }
  0x2f   : > { %678 = vperm.xlu2 %1136, %v337_v13  }
  0x35   : > { %683 = vperm.xlu0 %1134, %v338_v26   ;;  %828 = vperm.xlu1 %1135, %v340_v27  }
  0x36   : > { %1049 = vmatmul.msk.bf16.gmra.mxu0 %vm413_vm3, %v1087_v25  ;;  %1053 = vmatmul.msk.bf16.gmra.mxu1 %vm413_vm3, %v1087_v25 }
  0x46   : > { %1050 = vmatmul.msk.bf16.gmra.mxu0 %vm413_vm3, %v1088_v28  ;;  %1054 = vmatmul.msk.bf16.gmra.mxu1 %vm413_vm3, %v1088_v28 }
  0x56   : > { %1051 = vmatmul.msk.bf16.gmra.mxu0 %vm413_vm3, %v1089_v29  ;;  %1055 = vmatmul.msk.bf16.gmra.mxu1 %vm413_vm3, %v1089_v29 }
  0x71   : > { %v352_v36 = vpop.permute.xlu2 %351 }
  0x79   : > { %v357_v46 = vpop.permute.xlu2 %356 }
  0x87   : > { %v362_v35 = vpop.permute.xlu0 %361  ;;  %v508_v44 = vpop.permute.xlu1 %507 }
  0x8f   : > { %v367_v45 = vpop.permute.xlu0 %366  ;;  %v513_v5 = vpop.permute.xlu1 %512 }
  0x97   : > { %v387_v29 = vpop.permute.xlu1 %386 }
  0xa3   : > { %v440_v30 = vpop.f32.mrf.mxu0  ;;  %v469_v31 = vpop.f32.mrf.mxu1 }
  0xa4   : > { %v545_v40 = vpop.f32.mrf.mxu2  ;;  %v559_v41 = vpop.f32.mrf.mxu3  ;;  %v441_v60 = vadd.f32 %v440_v30, %v352_v36  ;;  %v470_v61 = vadd.f32 %v469_v31, %v352_v36 }
  0xa5   : > { %v546_v6 = vadd.f32 %v545_v40, %v508_v44  ;;  %v560_v8 = vadd.f32 %v559_v41, %v508_v44 }
  0xab   : > { %v442_v32 = vpop.f32.mrf.mxu0  ;;  %v471_v33 = vpop.f32.mrf.mxu1 }
  0xac   : > { %v443_v54 = vadd.f32 %v442_v32, %v357_v46  ;;  %v472_v55 = vadd.f32 %v471_v33, %v357_v46  ;;  %v547_v62 = vpop.f32.mrf.mxu2  ;;  %v561_v63 = vpop.f32.mrf.mxu3 }
  0xad   : > { %v548_v9 = vadd.f32 %v547_v62, %v513_v5  ;;  %v562_v10 = vadd.f32 %v561_v63, %v513_v5  ;;  %v382_v32 = vpop.permute.xlu0 %381  ;;  %v637_v5 = vpop.permute.xlu2 %636 }
  0xae   : > { %v597_v2 = vpack.c.bf16 %v443_v54, %v441_v60  ;;  %v598_v3 = vpack.c.bf16 %v472_v55, %v470_v61  ;;  %v377_v54 = vpop.permute.xlu1 %376 }
  0xaf   : > { %v564_v11 = vpack.c.bf16 %v548_v9, %v546_v6  ;;  %v565_v12 = vpack.c.bf16 %v562_v10, %v560_v8  ;;  %v668_v6 = vunpack.c.l.bf16 %v1310_v4  ;;  %v1091_v4 = vld [vmem:[%s1466_s4] sm:$0xff] }
  0xb3   : > { %v445_v38 = vpop.f32.mrf.mxu0  ;;  %v474_v39 = vpop.f32.mrf.mxu1 }
  0xb4   : > { %v446_v47 = vadd.f32 %v445_v38, %v362_v35  ;;  %v475_v49 = vadd.f32 %v474_v39, %v362_v35 }
  0xb6   : > { %v495_v56 = vmul.f32 %v1371_v48, %v446_v47  ;;  %v496_v57 = vmul.f32 %v1371_v48, %v475_v49 }
  0xbb   : > { %v447_v50 = vpop.f32.mrf.mxu0  ;;  %v476_v51 = vpop.f32.mrf.mxu1 }
  0xbc   : > { %v448_v52 = vadd.f32 %v447_v50, %v367_v45  ;;  %v477_v53 = vadd.f32 %v476_v51, %v367_v45 }
  0xbe   : > { %v497_v58 = vmul.f32 %v1371_v48, %v448_v52  ;;  %v498_v59 = vmul.f32 %v1371_v48, %v477_v53 }
  0xc0   : > { %v566_v0 = vpack.c.bf16 %v497_v58, %v495_v56  ;;  %v567_v1 = vpack.c.bf16 %v498_v59, %v496_v57  ;;  %v372_v57 = vpop.permute.xlu0 %371 }
  0xc2   : > { %575 = vmatpush.bf16.xpose.msrb.mxu2 %v566_v0  ;;  %589 = vmatpush.bf16.xpose.msrb.mxu3 %v567_v1 }
  0xc3   : > { %v450_v21 = vpop.f32.mrf.mxu0  ;;  %v479_v22 = vpop.f32.mrf.mxu1 }
  0xc4   : > { %v451_v58 = vadd.f32 %v450_v21, %v372_v57  ;;  %v480_v59 = vadd.f32 %v479_v22, %v372_v57  ;;  %v679_v22 = vpop.permute.xlu2 %678 }
  0xc6   : > { %v730_v61 = vpack.c.bf16 %v480_v59, %v451_v58  ;;  %v829_v58 = vpop.permute.xlu1 %828 }
  0xc8   : > { %v737_v63 = vunpack.c.l.b16 %v730_v61 }
  0xc9   : > { %576 = vmatmul.bf16.vlgmr.msrb.gmra.mxu2 %v564_v11  ;;  %590 = vmatmul.bf16.vlgmr.msrb.gmra.mxu3 %v565_v12 }
  0xca   : > { %610 = vmatpush.bf16.msra.mxu2 %v597_v2  ;;  %624 = vmatpush.bf16.msra.mxu3 %v598_v3  ;;  %v850_v2 = vunpack.c.h.b16 %v730_v61 }
  0xcb   : > { %v452_v23 = vpop.f32.mrf.mxu0  ;;  %v481_v24 = vpop.f32.mrf.mxu1 }
  0xcc   : > { %v453_v55 = vadd.f32 %v452_v23, %v377_v54  ;;  %v482_v56 = vadd.f32 %v481_v24, %v377_v54 }
  0xce   : > { %v731_v60 = vpack.c.bf16 %v482_v56, %v453_v55 }
  0xd0   : > { %v738_v62 = vunpack.c.l.b16 %v731_v60  ;;  %v851_v1 = vunpack.c.h.b16 %v731_v60 }
  0xd2   : > { %v739_v0 = vpack.c.b16 %v738_v62, %v737_v63  ;;  %v852_v3 = vpack.c.b16 %v851_v1, %v850_v2 }
  0xd3   : > { %v455_v25 = vpop.f32.mrf.mxu0  ;;  %v484_v26 = vpop.f32.mrf.mxu1 }
  0xd4   : > { %v456_v33 = vadd.f32 %v455_v25, %v382_v32  ;;  %v485_v34 = vadd.f32 %v484_v26, %v382_v32 }
  0xd6   : > { %v499_v37 = vmul.f32 %v1371_v48, %v456_v33  ;;  %v500_v38 = vmul.f32 %v1371_v48, %v485_v34 }
  0xd8   : > { %v732_v42 = vpack.c.bf16 %v500_v38, %v499_v37 }
  0xda   : > { %v743_v45 = vunpack.c.l.b16 %v732_v42  ;;  %v762_v46 = vunpack.c.h.b16 %v732_v42 }
  0xdb   : > { %v457_v27 = vpop.f32.mrf.mxu0  ;;  %v486_v28 = vpop.f32.mrf.mxu1 }
  0xdc   : > { %v458_v30 = vadd.f32 %v457_v27, %v387_v29  ;;  %v487_v31 = vadd.f32 %v486_v28, %v387_v29  ;;  %v684_v27 = vpop.permute.xlu0 %683 }
  0xde   : > { %v501_v35 = vmul.f32 %v1371_v48, %v458_v30  ;;  %v502_v36 = vmul.f32 %v1371_v48, %v487_v31  ;;  %v631_v48 = vld [vmem:[%s1467_s5] sm:$0xf] }
  0xe0   : > { %v733_v41 = vpack.c.bf16 %v502_v36, %v501_v35 }
  0xe2   : > { %v744_v43 = vunpack.c.l.b16 %v733_v41  ;;  %v763_v44 = vunpack.c.h.b16 %v733_v41 }
  0xe4   : > { %v745_v52 = vpack.c.b16 %v744_v43, %v743_v45  ;;  %v1389_v53 = vpack.c.b16 %v763_v44, %v762_v46 }
 0x14c   : > { %v577_v14 = vpop.f32.mrf.mxu2  ;;  %v591_v15 = vpop.f32.mrf.mxu3 }
 0x14d   : > { %v592_v18 = vadd.f32 %v591_v15, %v577_v14 }
 0x154   : > { %v579_v16 = vpop.f32.mrf.mxu2  ;;  %v593_v17 = vpop.f32.mrf.mxu3 }
 0x155   : > { %v594_v19 = vadd.f32 %v593_v17, %v579_v16 }
 0x157   : > { %v596_v20 = vpack.c.bf16 %v594_v19, %v592_v18 }
 0x159   : > { %1063 = vmatmul.msk.bf16.vlgmr.msra.gmra.mxu2 %vm599_vm5, %v596_v20  ;;  %1064 = vmatmul.msk.bf16.vlgmr.msra.gmra.mxu3 %vm599_vm5, %v596_v20 }
 0x1dc   : > { %v612_v39 = vpop.f32.mrf.mxu2  ;;  %v626_v40 = vpop.f32.mrf.mxu3 }
 0x1e4   : > { %v614_v47 = vpop.f32.mrf.mxu2  ;;  %v628_v49 = vpop.f32.mrf.mxu3 }
 0x1e5   : > { %v632_v50 = vpack.c.bf16 %v614_v47, %v612_v39  ;;  %v633_v51 = vpack.c.bf16 %v628_v49, %v626_v40 }
 0x1e7   : > { %649 = vmatpush.bf16.msrb.mxu2 %v632_v50  ;;  %662 = vmatpush.bf16.msrb.mxu3 %v633_v51 }
 0x1ea   : > { %1065 = vmatmul.msk.bf16.vlgmr.msrb.gmra.mxu2 %vm599_vm5, %v631_v48  ;;  %1066 = vmatmul.msk.bf16.vlgmr.msrb.gmra.mxu3 %vm599_vm5, %v631_v48 }
 0x1eb   : > { %754 = vmatpush.bf16.xpose.msra.mxu2 %v745_v52  ;;  %773 = vmatpush.bf16.xpose.msra.mxu3 %v1389_v53 }
 0x1f3   : > { %861 = vmatpush.bf16.xpose.msrb.mxu3 %v745_v52  ;;  %v734_v52 = vld [vmem:[%s1468_s6] sm:$0xf] }
 0x1fa   : > { %755 = vmatmul.bf16.vlgmr.msra.gmra.mxu2 %v739_v0  ;;  %774 = vmatmul.bf16.vlgmr.msra.gmra.mxu3 %v739_v0 }
 0x20a   : > { %862 = vmatmul.bf16.vlgmr.msrb.gmra.mxu3 %v852_v3 }
 0x26d   : > { %v651_v8 = vpop.f32.mrf.mxu2  ;;  %v664_v9 = vpop.f32.mrf.mxu3 }
 0x26e   : > { %v652_v10 = vadd.f32 %v651_v8, %v637_v5  ;;  %v665_v11 = vadd.f32 %v664_v9, %v637_v5 }
 0x270   : > { %v1399_v12 = vadd.f32 %v668_v6, %v652_v10  ;;  %v1401_v13 = vadd.f32 %v669_v7, %v665_v11 }
 0x272   : > { %v674_v14 = vpack.c.bf16 %v1399_v12, %v1399_v12  ;;  %v675_v15 = vpack.c.bf16 %v1401_v13, %v1401_v13 }
 0x274   : > { %v695_v16 = vsel %vm529_vm0, %v674_v14, 0  ;;  %v698_v17 = vsel %vm529_vm0, %v675_v15, 0 }
 0x275   : > { %v653_v18 = vpop.f32.mrf.mxu2  ;;  %v666_v19 = vpop.f32.mrf.mxu3  ;;  %707 = vmatpush.bf16.msrb.mxu0 %v695_v16  ;;  %721 = vmatpush.bf16.msrb.mxu1 %v698_v17 }
 0x278   : > { %1071 = vmatmul.msk.bf16.vlgmr.msrb.gmra.mxu0 %vm525_vm2, %v1091_v4  ;;  %1072 = vmatmul.msk.bf16.vlgmr.msrb.gmra.mxu1 %vm525_vm2, %v1091_v4 }
 0x27d   : > { %v756_v23 = vpop.f32.mrf.mxu2  ;;  %v775_v24 = vpop.f32.mrf.mxu3 }
 0x285   : > { %v758_v38 = vpop.f32.mrf.mxu2  ;;  %v777_v39 = vpop.f32.mrf.mxu3 }
 0x286   : > { %v761_v42 = vpack.c.bf16 %v758_v38, %v756_v23  ;;  %v780_v43 = vpack.c.bf16 %v777_v39, %v775_v24 }
 0x28d   : > { %v863_v48 = vpop.f32.mrf.mxu3 }
 0x295   : > { %v865_v56 = vpop.f32.mrf.mxu3 }
 0x296   : > { %v868_v57 = vpack.c.bf16 %v865_v56, %v863_v48 }
 0x2f5   : > { %v709_v20 = vpop.f32.mrf.mxu0  ;;  %v723_v21 = vpop.f32.mrf.mxu1 }
 0x2f6   : > { %v710_v25 = vadd.f32 %v709_v20, %v679_v22  ;;  %v724_v26 = vadd.f32 %v723_v21, %v679_v22 }
 0x2f8   : > { %v728_v30 = vpack.c.bf16 %v724_v26, %v710_v25 }
 0x2fa   : > { %v783_v34 = vunpack.c.h.b16 %v728_v30  ;;  %v804_v35 = vunpack.c.l.b16 %v728_v30 }
 0x2fd   : > { %v711_v28 = vpop.f32.mrf.mxu0  ;;  %v725_v29 = vpop.f32.mrf.mxu1 }
 0x2fe   : > { %v712_v31 = vadd.f32 %v711_v28, %v684_v27  ;;  %v726_v32 = vadd.f32 %v725_v29, %v684_v27 }
 0x300   : > { %v729_v33 = vpack.c.bf16 %v726_v32, %v712_v31 }
 0x302   : > { %v784_v36 = vunpack.c.h.b16 %v729_v33  ;;  %v805_v37 = vunpack.c.l.b16 %v729_v33 }
 0x304   : > { %v785_v40 = vpack.c.b16 %v784_v36, %v783_v34  ;;  %v806_v41 = vpack.c.b16 %v805_v37, %v804_v35 }
 0x306   : > { %797 = vmatpush.bf16.msra.mxu0 %v785_v40  ;;  %818 = vmatpush.bf16.msra.mxu1 %v806_v41 }
 0x309   : > { %1073 = vmatmul.msk.bf16.vlgmr.msra.gmra.mxu0 %vm599_vm5, %v780_v43  ;;  %1074 = vmatmul.msk.bf16.vlgmr.msra.gmra.mxu1 %vm599_vm5, %v761_v42 }
 0x30a   : > { %876 = vmatpush.bf16.xpose.msrb.mxu0 %v1389_v53  ;;  %894 = vmatpush.bf16.msrb.mxu1 %v785_v40 }
 0x319   : > { %877 = vmatmul.bf16.vlgmr.msrb.gmra.mxu0 %v852_v3 }
 0x386   : > { %v799_v44 = vpop.f32.mrf.mxu0  ;;  %v820_v45 = vpop.f32.mrf.mxu1 }
 0x387   : > { %v821_v49 = vadd.f32 %v820_v45, %v799_v44 }
 0x38e   : > { %v801_v46 = vpop.f32.mrf.mxu0  ;;  %v822_v47 = vpop.f32.mrf.mxu1 }
 0x38f   : > { %v823_v50 = vadd.f32 %v822_v47, %v801_v46 }
 0x391   : > { %v825_v51 = vpack.c.bf16 %v823_v50, %v821_v49 }
 0x393   : > { %841 = vmatpush.bf16.msrb.mxu2 %v825_v51 }
 0x396   : > { %1075 = vmatmul.msk.bf16.vlgmr.msrb.gmra.mxu2 %vm599_vm5, %v734_v52  ;;  %v878_v53 = vpop.f32.mrf.mxu0 }
 0x397   : > { %911 = vmatpush.bf16.msra.mxu2 %v806_v41 }
 0x39e   : > { %v880_v54 = vpop.f32.mrf.mxu0 }
 0x39f   : > { %v883_v55 = vpack.c.bf16 %v880_v54, %v878_v53 }
 0x3a1   : > { %1076 = vmatmul.msk.bf16.vlgmr.msrb.gmra.mxu1 %vm599_vm5, %v883_v55 }
 0x3a6   : > { %1077 = vmatmul.msk.bf16.vlgmr.msra.gmra.mxu2 %vm599_vm5, %v868_v57 }
 0x419   : > { %v843_v59 = vpop.f32.mrf.mxu2 }
 0x41a   : > { %v844_v60 = vadd.f32 %v843_v59, %v829_v58 }
 0x41c   : > { %v847_v61 = vadd.f32 %v844_v60, %v1399_v12 }
 0x41e   : > { %v848_v62 = vpack.c.bf16 %v847_v61, %v847_v61  ;;  %v896_v0 = vpop.f32.mrf.mxu1 }
 0x420   : > { %849 = vst [vmem:[%s313_s20] sm:$0xf] %v848_v62 }
 0x421   : > { %v845_v63 = vpop.f32.mrf.mxu2 }
 0x426   : > { %v898_v2 = vpop.f32.mrf.mxu1 }
 0x429   : > { %v913_v1 = vpop.f32.mrf.mxu2 }
 0x42a   : > { %v914_v5 = vadd.f32 %v913_v1, %v896_v0 }
 0x431   : > { %v915_v3 = vpop.f32.mrf.mxu2 }
 0x432   : > { %v916_v6 = vadd.f32 %v915_v3, %v898_v2 }
 0x434   : > { %v918_v7 = vpack.c.bf16 %v916_v6, %v914_v5 }
 0x436   : > { %926 = vmatpush.bf16.msra.mxu3 %v918_v7 }
 0x439   : > { %1078 = vmatmul.msk.bf16.vlgmr.msra.gmra.mxu3 %vm599_vm5, %v734_v52 }
 0x4bc   : > { %v928_v8 = vpop.f32.mrf.mxu3 }
 0x4bd   : > { %v929_v9 = vadd.f32 %v928_v8, %v829_v58 }
 0x4bf   : > { %v932_v10 = vadd.f32 %v929_v9, %v1401_v13 }
 0x4c1   : > { %v933_v11 = vpack.c.bf16 %v932_v10, %v932_v10 }
 0x4c3   : > { %934 = vst [vmem:[%s313_s20 + $0x4] sm:$0xf] %v933_v11 }
 0x4c4   : > { %v930_v12 = vpop.f32.mrf.mxu3 }
 0x4c5   : > { %1164 = shalt.err (!%p1161_p3)
}
 0x4c6   : > { %1093 = dma.vmem_to_hbm [thread:$0]  (%p1286_p5), %s950_s25, 128, %s952_s26, %s936_s10  }
 0x4c7 PF: > { %p1099_p4 = scmp.ge.s32.totalorder %s1199_s30, 2  ;;  %s963_s18 = sand.u32 1, %s1187_s27  }
 0x4c8   : > { %s964_s20 = scalar_lea.sflag [#allocation3], %s963_s18 }
 0x4c9   : > { %p1096_p7 = pnand %p1099_p4, %p1290_p6 }
 0x4cb   : > { %p1097_p8 = pneg %p1096_p7 }
 0x4cd   : > { %1182 = dma.done.wait (%p1097_p8), %s964_s20, 128  }
 0x4ce   : > { %1184 = vsyncadd (%p1097_p8), %s964_s20, 4294967168  ;;  %p18_p9 = scmp.ge.s32.totalorder %s1273_s11, 4   ;;  %s1473_s27 = smov %s1191_s28 }
 0x4cf   : > { %s1474_s28 = smov %s1195_s29  ;;  %s1475_s29 = smov %s1284_s14 }
 0x4d0   : > { %s1476_s30 = smov %s1273_s11  ;;  %20 = sbr.rel (!%p18_p9) target bundleno = 3 (0x3), region = 90 }
 0x4d5   :  { %970 = vsyncpa [#allocation3], 1 }
 0x4d6   :  { %972 = vsyncpa [#allocation3 + $0x1], 1 }

</bundles_post_ra>
